<compile_context>
chip_gen: v7x
topology: tpu7x:2x2x1
jax: 0.10.0
libtpu: 0.0.40
codegen_flags: <defaults>
</compile_context>

<pallas_src>
import numpy as np

import jax
import jax.numpy as jnp
from jax.experimental import pallas as pl
from jax.experimental.pallas import tpu as pltpu

# ----------------------------------------------------------------------------
# Model hyper-parameters (scaled-down version of the PyTorch module).
# ----------------------------------------------------------------------------
NBAG = 5            # instances per bag (x.squeeze(0) -> (NBAG, 3, H, W))
IMG = 18            # instance spatial size (real model: 130)
C1 = 8              # trunk channels (real: 64)
C2 = 16             # layer2 channels (real: 128)
FEAT = C2 * 2 * 2   # flattened feature size (real: 32768)
ATT_D = 64          # attention hidden dim D
ATT_K = 1           # attention heads K
NUM_CLASSES = 6

_VMEM = pl.BlockSpec(memory_space=pltpu.MemorySpace.VMEM)


# ----------------------------------------------------------------------------
# Constant-matrix builders (run once at setup, in numpy).
#
# Stage-1 layout: (NBAG * H, W * C), row = m*H + h, col = w*C + c.
# Stage-3 layout: (NBAG, H*W*C), col = (h*W + w)*C + c (per-instance HWC flatten).
# ----------------------------------------------------------------------------
def _row_maps(n, h_in, h_out, k, stride, pad):
    """R[di]: (n*h_out, n*h_in) selects input row stride*i+di-pad per instance.
    OOB rows become all-zero rows (zero padding; safe for pools since acts >= 0)."""
    R = np.zeros((k, n * h_out, n * h_in), np.float32)
    for di in range(k):
        for m in range(n):
            for i in range(h_out):
                r = stride * i + di - pad
                if 0 <= r < h_in:
                    R[di, m * h_out + i, m * h_in + r] = 1.0
    return R


def _band_mats(w_hwio, w_in, stride, pad):
    """B[di]: (w_in*cin, w_out*cout) Toeplitz band for one kernel-row shift."""
    k, _, cin, cout = w_hwio.shape
    w_out = (w_in + 2 * pad - k) // stride + 1
    B = np.zeros((k, w_in * cin, w_out * cout), np.float32)
    for di in range(k):
        for j in range(w_out):
            for dj in range(k):
                w = stride * j + dj - pad
                if 0 <= w < w_in:
                    B[di, w * cin:(w + 1) * cin,
                      j * cout:(j + 1) * cout] = w_hwio[di, dj]
    return B


def _pool_col_maps(w_in, c, k, stride, pad):
    """C[dj]: (w_in*c, w_out*c) per-channel column selection for a pool tap."""
    w_out = (w_in + 2 * pad - k) // stride + 1
    C = np.zeros((k, w_in * c, w_out * c), np.float32)
    for dj in range(k):
        for j in range(w_out):
            w = stride * j + dj - pad
            if 0 <= w < w_in:
                for ch in range(c):
                    C[dj, w * c + ch, j * c + ch] = 1.0
    return C


def _conv_toeplitz(w_hwio, h_in, w_in, stride, pad):
    """Whole 2-D conv as ONE matmul on the per-instance (H*W*C)-flattened layout."""
    k, _, cin, cout = w_hwio.shape
    h_out = (h_in + 2 * pad - k) // stride + 1
    w_out = (w_in + 2 * pad - k) // stride + 1
    T = np.zeros((h_in * w_in * cin, h_out * w_out * cout), np.float32)
    for i in range(h_out):
        for j in range(w_out):
            for di in range(k):
                for dj in range(k):
                    hi = stride * i + di - pad
                    wi = stride * j + dj - pad
                    if 0 <= hi < h_in and 0 <= wi < w_in:
                        rin = (hi * w_in + wi) * cin
                        cot = (i * w_out + j) * cout
                        T[rin:rin + cin, cot:cot + cout] += w_hwio[di, dj]
    return T


def _permute_head_rows(w):
    """Re-index Linear rows so the kernel's HWC layout (h*2+w)*C2+c matches the
    PyTorch NCHW view(-1, FEAT) index c*4 + h*2 + w (folds the flatten into W)."""
    wp = np.zeros_like(w)
    for f in range(FEAT):
        c, r = divmod(f, 4)            # f = c*(2*2) + (h*2 + w)
        wp[r * C2 + c] = w[f]
    return wp


class _SlabPacker:
    """Packs many small 2-D constants into one (rows, 128) slab with 16-row-
    aligned, left-justified blocks, so the kernel needs a single DMA and reads
    each block with a static, tile-aligned ref window."""

    def __init__(self, width=128, align=16):
        self.width = width
        self.align = align
        self.blocks = []
        self.layout = {}
        self.rows = 0

    def add(self, name, arr):
        arr = np.asarray(arr, np.float32)
        if arr.ndim == 1:
            arr = arr[None, :]
        r, c = arr.shape
        assert c <= self.width, (name, arr.shape)
        rp = -(-r // self.align) * self.align
        blk = np.zeros((rp, self.width), np.float32)
        blk[:r, :c] = arr
        self.layout[name] = (self.rows, r, c)
        self.blocks.append(blk)
        self.rows += rp

    def finalize(self, dtype):
        slab = np.concatenate(self.blocks, axis=0)
        return jnp.asarray(slab, dtype), dict(self.layout)


# ----------------------------------------------------------------------------
# The fused Pallas kernel (built with static slab layouts baked in).
# ----------------------------------------------------------------------------
def _make_kernel(wl, bl):
    def kernel(x_ref, w_ref, b_ref, o_ref):
        bf16 = jnp.bfloat16

        def W(name):
            off, r, c = wl[name]
            return w_ref[off:off + r, :c]

        def B(name):
            row, c = bl[name]
            return b_ref[row:row + 1, :c]

        def mm(a, b):
            # bf16 MXU inputs, f32 accumulation.
            return jnp.dot(a.astype(bf16), b.astype(bf16),
                           preferred_element_type=jnp.float32)

        # -- feature_extractor_part1: Conv2d(3, C1, 3) + ReLU + MaxPool2d(2, 2)
        x = x_ref[...]                                                 # (90, 54)
        h = (mm(mm(W("r0_0"), x), W("b0_0"))
             + mm(mm(W("r0_1"), x), W("b0_1"))
             + mm(mm(W("r0_2"), x), W("b0_2")))
        h = jnp.maximum(h + B("c0"), 0.0)                              # (80, 128)

        rows = jnp.maximum(mm(W("rp1_0"), h), mm(W("rp1_1"), h))       # (40, 128)
        cols = mm(rows, W("cp1"))                                      # (40, 128)
        h = jnp.maximum(cols[:, 0:64], cols[:, 64:128])                # (40, 64)

        # -- pre_layers1: ReLU (no-op on >=0 acts) + MaxPool2d(3, 2, padding=1)
        rows = jnp.maximum(jnp.maximum(mm(W("rp2_0"), h), mm(W("rp2_1"), h)),
                           mm(W("rp2_2"), h))                          # (20, 64)
        cols = mm(rows, W("cp2"))                                      # (20, 96)
        h = jnp.maximum(jnp.maximum(cols[:, 0:32], cols[:, 32:64]),
                        cols[:, 64:96])                                # (20, 32)

        # -- layout change (NBAG*4, 4*C1) -> per-instance flattened (NBAG, 128)
        g = (mm(mm(W("s4_0"), h), W("e4_0"))
             + mm(mm(W("s4_1"), h), W("e4_1"))
             + mm(mm(W("s4_2"), h), W("e4_2"))
             + mm(mm(W("s4_3"), h), W("e4_3")))                        # (5, 128)

        def conv(xin, name, relu=True):
            y = mm(xin, W("t_" + name)) + B("b_" + name)
            return jnp.maximum(y, 0.0) if relu else y

        # -- layer1: two BasicBlocks, C1 -> C1, stride 1 (BN folded)
        t = conv(g, "l1b1_c1")
        g = jnp.maximum(conv(t, "l1b1_c2", relu=False) + g, 0.0)
        t = conv(g, "l1b2_c1")
        g = jnp.maximum(conv(t, "l1b2_c2", relu=False) + g, 0.0)
        # -- layer2 block1: stride-2 conv + 1x1 stride-2 downsample branch
        t = conv(g, "l2b1_c1")                                          # (5, 64)
        u = conv(t, "l2b1_c2", relu=False)
        idn = mm(g, W("t_l2b1_ds")) + B("b_l2b1_ds")
        g = jnp.maximum(u + idn, 0.0)
        # -- layer2 block2: C2 -> C2, stride 1
        t = conv(g, "l2b2_c1")
        g = jnp.maximum(conv(t, "l2b2_c2", relu=False) + g, 0.0)        # (5, 64)

        # -- MIL head (NCHW flatten folded into head weight rows)
        a1 = jnp.tanh(mm(g, W("att_w1")) + B("att_b1"))                 # (5, D)
        a2 = mm(a1, W("att_w2")) + B("att_b2")                          # (5, 1)
        a2 = a2 - jnp.max(a2, axis=0, keepdims=True)
        e = jnp.exp(a2)
        attn = e * pl.reciprocal(jnp.sum(e, axis=0, keepdims=True), approx=True)
        m = jnp.sum(attn * g, axis=0, keepdims=True)                    # (1, FEAT)
        o_ref[...] = (mm(m, W("cls_w")) + B("cls_b")).astype(o_ref.dtype)

    return kernel


def mil_resnet18_forward(x, wslab, bslab, wlayout, blayout):
    # x: (1, NBAG, 3, IMG, IMG) NCHW; tiny boundary reshape stays fused in the jit.
    x2d = jnp.transpose(x[0], (0, 2, 3, 1)).reshape(NBAG * IMG, IMG * 3)
    x2d = x2d.astype(jnp.bfloat16)
    return pl.pallas_call(
        _make_kernel(wlayout, blayout),
        out_shape=jax.ShapeDtypeStruct((ATT_K, NUM_CLASSES), jnp.float32),
        in_specs=[_VMEM, _VMEM, _VMEM],
        out_specs=_VMEM,
    )(x2d, wslab, bslab)


# ----------------------------------------------------------------------------
# Deterministic synthetic parameters (BatchNorm folded into conv weights).
# ----------------------------------------------------------------------------
def _fold_bn(w, b, key, cout, eps=1e-5):
    kg, kb, km, kv = jax.random.split(key, 4)
    gamma = 1.0 + 0.1 * jax.random.normal(kg, (cout,), jnp.float32)
    beta = 0.1 * jax.random.normal(kb, (cout,), jnp.float32)
    mean = 0.1 * jax.random.normal(km, (cout,), jnp.float32)
    var = 1.0 + 0.1 * jnp.abs(jax.random.normal(kv, (cout,), jnp.float32))
    scale = gamma / jnp.sqrt(var + eps)
    return w * scale, (b - mean) * scale + beta


def _make_block(key, cin, cout, stride):
    k1, k2, k3, k4, k5, k6 = jax.random.split(key, 6)
    w1 = 0.1 * jax.random.normal(k1, (3, 3, cin, cout), jnp.float32)
    w1, b1 = _fold_bn(w1, jnp.zeros((cout,), jnp.float32), k2, cout)
    w2 = 0.1 * jax.random.normal(k3, (3, 3, cout, cout), jnp.float32)
    w2, b2 = _fold_bn(w2, jnp.zeros((cout,), jnp.float32), k4, cout)
    blk = dict(w1=w1, b1=b1, w2=w2, b2=b2, stride=stride)
    if stride != 1 or cin != cout:
        wd = 0.1 * jax.random.normal(k5, (1, 1, cin, cout), jnp.float32)
        wd, bd = _fold_bn(wd, jnp.zeros((cout,), jnp.float32), k6, cout)
        blk.update(wd=wd, bd=bd)
    return blk


def init_params(key):
    ks = jax.random.split(key, 10)
    return {
        "conv0_w": 0.1 * jax.random.normal(ks[0], (3, 3, 3, C1), jnp.float32),
        "conv0_b": 0.1 * jax.random.normal(ks[1], (C1,), jnp.float32),
        "l1b1": _make_block(ks[2], C1, C1, 1),
        "l1b2": _make_block(ks[3], C1, C1, 1),
        "l2b1": _make_block(ks[4], C1, C2, 2),
        "l2b2": _make_block(ks[5], C2, C2, 1),
        # Linear weights stored as (in_features, out_features)
        "att_w1": 0.1 * jax.random.normal(ks[6], (FEAT, ATT_D), jnp.float32),
        "att_b1": jnp.zeros((ATT_D,), jnp.float32),
        "att_w2": 0.1 * jax.random.normal(ks[7], (ATT_D, ATT_K), jnp.float32),
        "att_b2": jnp.zeros((ATT_K,), jnp.float32),
        "cls_w": 0.1 * jax.random.normal(ks[8], (FEAT * ATT_K, NUM_CLASSES),
                                         jnp.float32),
        "cls_b": 0.1 * jax.random.normal(ks[9], (NUM_CLASSES,), jnp.float32),
    }


def _np(x):
    return np.asarray(jax.device_get(x), np.float32)


def build_consts(params):
    """Pack every kernel constant into one bf16 weight slab + one f32 bias slab."""
    wp = _SlabPacker(width=128, align=16)
    biases = {}

    # conv0: 3x3, stride 1, pad 0, 3 -> C1
    conv0_w, conv0_b = _np(params["conv0_w"]), _np(params["conv0_b"])
    R0 = _row_maps(NBAG, IMG, IMG - 2, 3, 1, 0)
    B0 = _band_mats(conv0_w, IMG, 1, 0)
    for d in range(3):
        wp.add(f"r0_{d}", R0[d])
        wp.add(f"b0_{d}", B0[d])
    biases["c0"] = np.tile(conv0_b, IMG - 2)

    # MaxPool2d(2, 2): 16 -> 8 (column taps hstacked into one matmul)
    Rp1 = _row_maps(NBAG, 16, 8, 2, 2, 0)
    Cp1 = _pool_col_maps(16, C1, 2, 2, 0)
    wp.add("rp1_0", Rp1[0]); wp.add("rp1_1", Rp1[1])
    wp.add("cp1", np.concatenate([Cp1[0], Cp1[1]], axis=1))

    # MaxPool2d(3, 2, padding=1): 8 -> 4
    Rp2 = _row_maps(NBAG, 8, 4, 3, 2, 1)
    Cp2 = _pool_col_maps(8, C1, 3, 2, 1)
    for d in range(3):
        wp.add(f"rp2_{d}", Rp2[d])
    wp.add("cp2", np.concatenate([Cp2[0], Cp2[1], Cp2[2]], axis=1))

    # layout change (NBAG*4, 4*C1) -> (NBAG, 4*4*C1): row selectors + column embeds
    for hh in range(4):
        S = np.zeros((NBAG, NBAG * 4), np.float32)
        for m in range(NBAG):
            S[m, m * 4 + hh] = 1.0
        E = np.zeros((4 * C1, 16 * C1), np.float32)
        for j in range(4 * C1):
            E[j, hh * 4 * C1 + j] = 1.0
        wp.add(f"s4_{hh}", S)
        wp.add(f"e4_{hh}", E)

    # layer1 / layer2 convs as full 2-D Toeplitz matmuls (per-instance layout)
    def add_conv(name, w, b, h_in, w_in, stride, pad):
        k = w.shape[0]
        wp.add("t_" + name, _conv_toeplitz(w, h_in, w_in, stride, pad))
        h_out = (h_in + 2 * pad - k) // stride + 1
        w_out = (w_in + 2 * pad - k) // stride + 1
        biases["b_" + name] = np.tile(b, h_out * w_out)

    for bname in ("l1b1", "l1b2"):
        blk = params[bname]
        add_conv(f"{bname}_c1", _np(blk["w1"]), _np(blk["b1"]), 4, 4, 1, 1)
        add_conv(f"{bname}_c2", _np(blk["w2"]), _np(blk["b2"]), 4, 4, 1, 1)
    blk = params["l2b1"]
    add_conv("l2b1_c1", _np(blk["w1"]), _np(blk["b1"]), 4, 4, 2, 1)
    add_conv("l2b1_c2", _np(blk["w2"]), _np(blk["b2"]), 2, 2, 1, 1)
    add_conv("l2b1_ds", _np(blk["wd"]), _np(blk["bd"]), 4, 4, 2, 0)
    blk = params["l2b2"]
    add_conv("l2b2_c1", _np(blk["w1"]), _np(blk["b1"]), 2, 2, 1, 1)
    add_conv("l2b2_c2", _np(blk["w2"]), _np(blk["b2"]), 2, 2, 1, 1)

    # MIL head (NCHW flatten folded into the weight rows)
    wp.add("att_w1", _permute_head_rows(_np(params["att_w1"])))
    wp.add("att_w2", _np(params["att_w2"]))
    wp.add("cls_w", _permute_head_rows(_np(params["cls_w"])))
    biases["att_b1"] = _np(params["att_b1"])
    biases["att_b2"] = _np(params["att_b2"])
    biases["cls_b"] = _np(params["cls_b"])

    wslab, wlayout = wp.finalize(jnp.bfloat16)

    names = list(biases.keys())
    nrows = -(-len(names) // 8) * 8
    bs = np.zeros((nrows, 128), np.float32)
    blayout = {}
    for i, n in enumerate(names):
        v = np.asarray(biases[n], np.float32).reshape(-1)
        bs[i, :v.size] = v
        blayout[n] = (i, v.size)
    bslab = jnp.asarray(bs)
    return wslab, wlayout, bslab, blayout


if __name__ == "__main__":
    key = jax.random.PRNGKey(0)
    kp, kx = jax.random.split(key)
    params = init_params(kp)
    wslab, wlayout, bslab, blayout = build_consts(params)
    x = jax.random.normal(kx, (1, NBAG, 3, IMG, IMG), jnp.float32)

    fwd = jax.jit(lambda xx: mil_resnet18_forward(xx, wslab, bslab,
                                                  wlayout, blayout))
    y_hat = jax.block_until_ready(fwd(x))

    assert y_hat.shape == (ATT_K, NUM_CLASSES), y_hat.shape
    assert y_hat.dtype == jnp.float32
    assert bool(jnp.all(jnp.isfinite(y_hat)))
    print("KERNEL_OK")
</pallas_src>

<mosaic_0001>
module attributes {stable_mosaic.version = 11 : i64} {
  func.func @kernel(%arg0: memref<90x54xbf16, #tpu.memory_space<vmem>>, %arg1: memref<2160x128xbf16, #tpu.memory_space<vmem>>, %arg2: memref<16x128xf32, #tpu.memory_space<vmem>>, %arg3: memref<1x6xf32, #tpu.memory_space<vmem>>) attributes {dimension_semantics = [], scalar_prefetch = 0 : i64, scratch_operands = 0 : i64, tpu.core_type = #tpu.core_type<tc>} {
    %c0 = arith.constant 0 : index
    %c0_0 = arith.constant 0 : index
    %0 = vector.load %arg0[%c0, %c0_0] : memref<90x54xbf16, #tpu.memory_space<vmem>>, vector<90x54xbf16>
    %c0_1 = arith.constant 0 : index
    %c0_2 = arith.constant 0 : index
    %1 = vector.load %arg1[%c0_1, %c0_2] : memref<2160x128xbf16, #tpu.memory_space<vmem>>, vector<80x90xbf16>
    %cst = arith.constant dense<0.000000e+00> : vector<80x54xf32>
    %2 = tpu.matmul %1, %0, %cst {dimension_numbers = #tpu.dot_dimension_numbers<[1], [0], [0], [1], [0, 0, 1, 1], [], []>} : vector<80x90xbf16>, vector<90x54xbf16>, vector<80x54xf32> -> vector<80x54xf32>
    %c80 = arith.constant 80 : index
    %c0_3 = arith.constant 0 : index
    %3 = vector.load %arg1[%c80, %c0_3] : memref<2160x128xbf16, #tpu.memory_space<vmem>>, vector<54x128xbf16>
    %4 = arith.truncf %2 : vector<80x54xf32> to vector<80x54xbf16>
    %cst_4 = arith.constant dense<0.000000e+00> : vector<80x128xf32>
    %5 = tpu.matmul %4, %3, %cst_4 {dimension_numbers = #tpu.dot_dimension_numbers<[1], [0], [0], [1], [0, 0, 1, 1], [], []>} : vector<80x54xbf16>, vector<54x128xbf16>, vector<80x128xf32> -> vector<80x128xf32>
    %c144 = arith.constant 144 : index
    %c0_5 = arith.constant 0 : index
    %6 = vector.load %arg1[%c144, %c0_5] : memref<2160x128xbf16, #tpu.memory_space<vmem>>, vector<80x90xbf16>
    %cst_6 = arith.constant dense<0.000000e+00> : vector<80x54xf32>
    %7 = tpu.matmul %6, %0, %cst_6 {dimension_numbers = #tpu.dot_dimension_numbers<[1], [0], [0], [1], [0, 0, 1, 1], [], []>} : vector<80x90xbf16>, vector<90x54xbf16>, vector<80x54xf32> -> vector<80x54xf32>
    %c224 = arith.constant 224 : index
    %c0_7 = arith.constant 0 : index
    %8 = vector.load %arg1[%c224, %c0_7] : memref<2160x128xbf16, #tpu.memory_space<vmem>>, vector<54x128xbf16>
    %9 = arith.truncf %7 : vector<80x54xf32> to vector<80x54xbf16>
    %cst_8 = arith.constant dense<0.000000e+00> : vector<80x128xf32>
    %10 = tpu.matmul %9, %8, %cst_8 {dimension_numbers = #tpu.dot_dimension_numbers<[1], [0], [0], [1], [0, 0, 1, 1], [], []>} : vector<80x54xbf16>, vector<54x128xbf16>, vector<80x128xf32> -> vector<80x128xf32>
    %11 = arith.addf %5, %10 : vector<80x128xf32>
    %c288 = arith.constant 288 : index
    %c0_9 = arith.constant 0 : index
    %12 = vector.load %arg1[%c288, %c0_9] : memref<2160x128xbf16, #tpu.memory_space<vmem>>, vector<80x90xbf16>
    %cst_10 = arith.constant dense<0.000000e+00> : vector<80x54xf32>
    %13 = tpu.matmul %12, %0, %cst_10 {dimension_numbers = #tpu.dot_dimension_numbers<[1], [0], [0], [1], [0, 0, 1, 1], [], []>} : vector<80x90xbf16>, vector<90x54xbf16>, vector<80x54xf32> -> vector<80x54xf32>
    %c368 = arith.constant 368 : index
    %c0_11 = arith.constant 0 : index
    %14 = vector.load %arg1[%c368, %c0_11] : memref<2160x128xbf16, #tpu.memory_space<vmem>>, vector<54x128xbf16>
    %15 = arith.truncf %13 : vector<80x54xf32> to vector<80x54xbf16>
    %cst_12 = arith.constant dense<0.000000e+00> : vector<80x128xf32>
    %16 = tpu.matmul %15, %14, %cst_12 {dimension_numbers = #tpu.dot_dimension_numbers<[1], [0], [0], [1], [0, 0, 1, 1], [], []>} : vector<80x54xbf16>, vector<54x128xbf16>, vector<80x128xf32> -> vector<80x128xf32>
    %17 = arith.addf %11, %16 : vector<80x128xf32>
    %c0_13 = arith.constant 0 : index
    %c0_14 = arith.constant 0 : index
    %18 = vector.load %arg2[%c0_13, %c0_14] : memref<16x128xf32, #tpu.memory_space<vmem>>, vector<1x128xf32>
    %19 = vector.broadcast %18 : vector<1x128xf32> to vector<80x128xf32>
    %20 = arith.addf %17, %19 : vector<80x128xf32>
    %cst_15 = arith.constant 0.000000e+00 : f32
    %21 = vector.broadcast %cst_15 : f32 to vector<80x128xf32>
    %22 = arith.maximumf %20, %21 : vector<80x128xf32>
    %c432 = arith.constant 432 : index
    %c0_16 = arith.constant 0 : index
    %23 = vector.load %arg1[%c432, %c0_16] : memref<2160x128xbf16, #tpu.memory_space<vmem>>, vector<40x80xbf16>
    %24 = arith.truncf %22 : vector<80x128xf32> to vector<80x128xbf16>
    %cst_17 = arith.constant dense<0.000000e+00> : vector<40x128xf32>
    %25 = tpu.matmul %23, %24, %cst_17 {dimension_numbers = #tpu.dot_dimension_numbers<[1], [0], [0], [1], [0, 0, 1, 1], [], []>} : vector<40x80xbf16>, vector<80x128xbf16>, vector<40x128xf32> -> vector<40x128xf32>
    %c480 = arith.constant 480 : index
    %c0_18 = arith.constant 0 : index
    %26 = vector.load %arg1[%c480, %c0_18] : memref<2160x128xbf16, #tpu.memory_space<vmem>>, vector<40x80xbf16>
    %27 = arith.truncf %22 : vector<80x128xf32> to vector<80x128xbf16>
    %cst_19 = arith.constant dense<0.000000e+00> : vector<40x128xf32>
    %28 = tpu.matmul %26, %27, %cst_19 {dimension_numbers = #tpu.dot_dimension_numbers<[1], [0], [0], [1], [0, 0, 1, 1], [], []>} : vector<40x80xbf16>, vector<80x128xbf16>, vector<40x128xf32> -> vector<40x128xf32>
    %29 = arith.maximumf %25, %28 : vector<40x128xf32>
    %c528 = arith.constant 528 : index
    %c0_20 = arith.constant 0 : index
    %30 = vector.load %arg1[%c528, %c0_20] : memref<2160x128xbf16, #tpu.memory_space<vmem>>, vector<128x128xbf16>
    %31 = arith.truncf %29 : vector<40x128xf32> to vector<40x128xbf16>
    %cst_21 = arith.constant dense<0.000000e+00> : vector<40x128xf32>
    %32 = tpu.matmul %31, %30, %cst_21 {dimension_numbers = #tpu.dot_dimension_numbers<[1], [0], [0], [1], [0, 0, 1, 1], [], []>} : vector<40x128xbf16>, vector<128x128xbf16>, vector<40x128xf32> -> vector<40x128xf32>
    %33 = vector.extract_strided_slice %32 {offsets = [0, 0], sizes = [40, 64], strides = [1, 1]} : vector<40x128xf32> to vector<40x64xf32>
    %34 = vector.extract_strided_slice %32 {offsets = [0, 64], sizes = [40, 64], strides = [1, 1]} : vector<40x128xf32> to vector<40x64xf32>
    %35 = arith.maximumf %33, %34 : vector<40x64xf32>
    %c656 = arith.constant 656 : index
    %c0_22 = arith.constant 0 : index
    %36 = vector.load %arg1[%c656, %c0_22] : memref<2160x128xbf16, #tpu.memory_space<vmem>>, vector<20x40xbf16>
    %37 = arith.truncf %35 : vector<40x64xf32> to vector<40x64xbf16>
    %cst_23 = arith.constant dense<0.000000e+00> : vector<20x64xf32>
    %38 = tpu.matmul %36, %37, %cst_23 {dimension_numbers = #tpu.dot_dimension_numbers<[1], [0], [0], [1], [0, 0, 1, 1], [], []>} : vector<20x40xbf16>, vector<40x64xbf16>, vector<20x64xf32> -> vector<20x64xf32>
    %c688 = arith.constant 688 : index
    %c0_24 = arith.constant 0 : index
    %39 = vector.load %arg1[%c688, %c0_24] : memref<2160x128xbf16, #tpu.memory_space<vmem>>, vector<20x40xbf16>
    %40 = arith.truncf %35 : vector<40x64xf32> to vector<40x64xbf16>
    %cst_25 = arith.constant dense<0.000000e+00> : vector<20x64xf32>
    %41 = tpu.matmul %39, %40, %cst_25 {dimension_numbers = #tpu.dot_dimension_numbers<[1], [0], [0], [1], [0, 0, 1, 1], [], []>} : vector<20x40xbf16>, vector<40x64xbf16>, vector<20x64xf32> -> vector<20x64xf32>
    %42 = arith.maximumf %38, %41 : vector<20x64xf32>
    %c720 = arith.constant 720 : index
    %c0_26 = arith.constant 0 : index
    %43 = vector.load %arg1[%c720, %c0_26] : memref<2160x128xbf16, #tpu.memory_space<vmem>>, vector<20x40xbf16>
    %44 = arith.truncf %35 : vector<40x64xf32> to vector<40x64xbf16>
    %cst_27 = arith.constant dense<0.000000e+00> : vector<20x64xf32>
    %45 = tpu.matmul %43, %44, %cst_27 {dimension_numbers = #tpu.dot_dimension_numbers<[1], [0], [0], [1], [0, 0, 1, 1], [], []>} : vector<20x40xbf16>, vector<40x64xbf16>, vector<20x64xf32> -> vector<20x64xf32>
    %46 = arith.maximumf %42, %45 : vector<20x64xf32>
    %c752 = arith.constant 752 : index
    %c0_28 = arith.constant 0 : index
    %47 = vector.load %arg1[%c752, %c0_28] : memref<2160x128xbf16, #tpu.memory_space<vmem>>, vector<64x96xbf16>
    %48 = arith.truncf %46 : vector<20x64xf32> to vector<20x64xbf16>
    %cst_29 = arith.constant dense<0.000000e+00> : vector<20x96xf32>
    %49 = tpu.matmul %48, %47, %cst_29 {dimension_numbers = #tpu.dot_dimension_numbers<[1], [0], [0], [1], [0, 0, 1, 1], [], []>} : vector<20x64xbf16>, vector<64x96xbf16>, vector<20x96xf32> -> vector<20x96xf32>
    %50 = vector.extract_strided_slice %49 {offsets = [0, 0], sizes = [20, 32], strides = [1, 1]} : vector<20x96xf32> to vector<20x32xf32>
    %51 = vector.extract_strided_slice %49 {offsets = [0, 32], sizes = [20, 32], strides = [1, 1]} : vector<20x96xf32> to vector<20x32xf32>
    %52 = arith.maximumf %50, %51 : vector<20x32xf32>
    %53 = vector.extract_strided_slice %49 {offsets = [0, 64], sizes = [20, 32], strides = [1, 1]} : vector<20x96xf32> to vector<20x32xf32>
    %54 = arith.maximumf %52, %53 : vector<20x32xf32>
    %c816 = arith.constant 816 : index
    %c0_30 = arith.constant 0 : index
    %55 = vector.load %arg1[%c816, %c0_30] : memref<2160x128xbf16, #tpu.memory_space<vmem>>, vector<5x20xbf16>
    %56 = arith.truncf %54 : vector<20x32xf32> to vector<20x32xbf16>
    %cst_31 = arith.constant dense<0.000000e+00> : vector<5x32xf32>
    %57 = tpu.matmul %55, %56, %cst_31 {dimension_numbers = #tpu.dot_dimension_numbers<[1], [0], [0], [1], [0, 0, 1, 1], [], []>} : vector<5x20xbf16>, vector<20x32xbf16>, vector<5x32xf32> -> vector<5x32xf32>
    %c832 = arith.constant 832 : index
    %c0_32 = arith.constant 0 : index
    %58 = vector.load %arg1[%c832, %c0_32] : memref<2160x128xbf16, #tpu.memory_space<vmem>>, vector<32x128xbf16>
    %59 = arith.truncf %57 : vector<5x32xf32> to vector<5x32xbf16>
    %cst_33 = arith.constant dense<0.000000e+00> : vector<5x128xf32>
    %60 = tpu.matmul %59, %58, %cst_33 {dimension_numbers = #tpu.dot_dimension_numbers<[1], [0], [0], [1], [0, 0, 1, 1], [], []>} : vector<5x32xbf16>, vector<32x128xbf16>, vector<5x128xf32> -> vector<5x128xf32>
    %c864 = arith.constant 864 : index
    %c0_34 = arith.constant 0 : index
    %61 = vector.load %arg1[%c864, %c0_34] : memref<2160x128xbf16, #tpu.memory_space<vmem>>, vector<5x20xbf16>
    %62 = arith.truncf %54 : vector<20x32xf32> to vector<20x32xbf16>
    %cst_35 = arith.constant dense<0.000000e+00> : vector<5x32xf32>
    %63 = tpu.matmul %61, %62, %cst_35 {dimension_numbers = #tpu.dot_dimension_numbers<[1], [0], [0], [1], [0, 0, 1, 1], [], []>} : vector<5x20xbf16>, vector<20x32xbf16>, vector<5x32xf32> -> vector<5x32xf32>
    %c880 = arith.constant 880 : index
    %c0_36 = arith.constant 0 : index
    %64 = vector.load %arg1[%c880, %c0_36] : memref<2160x128xbf16, #tpu.memory_space<vmem>>, vector<32x128xbf16>
    %65 = arith.truncf %63 : vector<5x32xf32> to vector<5x32xbf16>
    %cst_37 = arith.constant dense<0.000000e+00> : vector<5x128xf32>
    %66 = tpu.matmul %65, %64, %cst_37 {dimension_numbers = #tpu.dot_dimension_numbers<[1], [0], [0], [1], [0, 0, 1, 1], [], []>} : vector<5x32xbf16>, vector<32x128xbf16>, vector<5x128xf32> -> vector<5x128xf32>
    %67 = arith.addf %60, %66 : vector<5x128xf32>
    %c912 = arith.constant 912 : index
    %c0_38 = arith.constant 0 : index
    %68 = vector.load %arg1[%c912, %c0_38] : memref<2160x128xbf16, #tpu.memory_space<vmem>>, vector<5x20xbf16>
    %69 = arith.truncf %54 : vector<20x32xf32> to vector<20x32xbf16>
    %cst_39 = arith.constant dense<0.000000e+00> : vector<5x32xf32>
    %70 = tpu.matmul %68, %69, %cst_39 {dimension_numbers = #tpu.dot_dimension_numbers<[1], [0], [0], [1], [0, 0, 1, 1], [], []>} : vector<5x20xbf16>, vector<20x32xbf16>, vector<5x32xf32> -> vector<5x32xf32>
    %c928 = arith.constant 928 : index
    %c0_40 = arith.constant 0 : index
    %71 = vector.load %arg1[%c928, %c0_40] : memref<2160x128xbf16, #tpu.memory_space<vmem>>, vector<32x128xbf16>
    %72 = arith.truncf %70 : vector<5x32xf32> to vector<5x32xbf16>
    %cst_41 = arith.constant dense<0.000000e+00> : vector<5x128xf32>
    %73 = tpu.matmul %72, %71, %cst_41 {dimension_numbers = #tpu.dot_dimension_numbers<[1], [0], [0], [1], [0, 0, 1, 1], [], []>} : vector<5x32xbf16>, vector<32x128xbf16>, vector<5x128xf32> -> vector<5x128xf32>
    %74 = arith.addf %67, %73 : vector<5x128xf32>
    %c960 = arith.constant 960 : index
    %c0_42 = arith.constant 0 : index
    %75 = vector.load %arg1[%c960, %c0_42] : memref<2160x128xbf16, #tpu.memory_space<vmem>>, vector<5x20xbf16>
    %76 = arith.truncf %54 : vector<20x32xf32> to vector<20x32xbf16>
    %cst_43 = arith.constant dense<0.000000e+00> : vector<5x32xf32>
    %77 = tpu.matmul %75, %76, %cst_43 {dimension_numbers = #tpu.dot_dimension_numbers<[1], [0], [0], [1], [0, 0, 1, 1], [], []>} : vector<5x20xbf16>, vector<20x32xbf16>, vector<5x32xf32> -> vector<5x32xf32>
    %c976 = arith.constant 976 : index
    %c0_44 = arith.constant 0 : index
    %78 = vector.load %arg1[%c976, %c0_44] : memref<2160x128xbf16, #tpu.memory_space<vmem>>, vector<32x128xbf16>
    %79 = arith.truncf %77 : vector<5x32xf32> to vector<5x32xbf16>
    %cst_45 = arith.constant dense<0.000000e+00> : vector<5x128xf32>
    %80 = tpu.matmul %79, %78, %cst_45 {dimension_numbers = #tpu.dot_dimension_numbers<[1], [0], [0], [1], [0, 0, 1, 1], [], []>} : vector<5x32xbf16>, vector<32x128xbf16>, vector<5x128xf32> -> vector<5x128xf32>
    %81 = arith.addf %74, %80 : vector<5x128xf32>
    %c1008 = arith.constant 1008 : index
    %c0_46 = arith.constant 0 : index
    %82 = vector.load %arg1[%c1008, %c0_46] : memref<2160x128xbf16, #tpu.memory_space<vmem>>, vector<128x128xbf16>
    %83 = arith.truncf %81 : vector<5x128xf32> to vector<5x128xbf16>
    %cst_47 = arith.constant dense<0.000000e+00> : vector<5x128xf32>
    %84 = tpu.matmul %83, %82, %cst_47 {dimension_numbers = #tpu.dot_dimension_numbers<[1], [0], [0], [1], [0, 0, 1, 1], [], []>} : vector<5x128xbf16>, vector<128x128xbf16>, vector<5x128xf32> -> vector<5x128xf32>
    %c1 = arith.constant 1 : index
    %c0_48 = arith.constant 0 : index
    %85 = vector.load %arg2[%c1, %c0_48] : memref<16x128xf32, #tpu.memory_space<vmem>>, vector<1x128xf32>
    %86 = vector.broadcast %85 : vector<1x128xf32> to vector<5x128xf32>
    %87 = arith.addf %84, %86 : vector<5x128xf32>
    %cst_49 = arith.constant 0.000000e+00 : f32
    %88 = vector.broadcast %cst_49 : f32 to vector<5x128xf32>
    %89 = arith.maximumf %87, %88 : vector<5x128xf32>
    %c1136 = arith.constant 1136 : index
    %c0_50 = arith.constant 0 : index
    %90 = vector.load %arg1[%c1136, %c0_50] : memref<2160x128xbf16, #tpu.memory_space<vmem>>, vector<128x128xbf16>
    %91 = arith.truncf %89 : vector<5x128xf32> to vector<5x128xbf16>
    %cst_51 = arith.constant dense<0.000000e+00> : vector<5x128xf32>
    %92 = tpu.matmul %91, %90, %cst_51 {dimension_numbers = #tpu.dot_dimension_numbers<[1], [0], [0], [1], [0, 0, 1, 1], [], []>} : vector<5x128xbf16>, vector<128x128xbf16>, vector<5x128xf32> -> vector<5x128xf32>
    %c2 = arith.constant 2 : index
    %c0_52 = arith.constant 0 : index
    %93 = vector.load %arg2[%c2, %c0_52] : memref<16x128xf32, #tpu.memory_space<vmem>>, vector<1x128xf32>
    %94 = vector.broadcast %93 : vector<1x128xf32> to vector<5x128xf32>
    %95 = arith.addf %92, %94 : vector<5x128xf32>
    %96 = arith.addf %95, %81 : vector<5x128xf32>
    %cst_53 = arith.constant 0.000000e+00 : f32
    %97 = vector.broadcast %cst_53 : f32 to vector<5x128xf32>
    %98 = arith.maximumf %96, %97 : vector<5x128xf32>
    %c1264 = arith.constant 1264 : index
    %c0_54 = arith.constant 0 : index
    %99 = vector.load %arg1[%c1264, %c0_54] : memref<2160x128xbf16, #tpu.memory_space<vmem>>, vector<128x128xbf16>
    %100 = arith.truncf %98 : vector<5x128xf32> to vector<5x128xbf16>
    %cst_55 = arith.constant dense<0.000000e+00> : vector<5x128xf32>
    %101 = tpu.matmul %100, %99, %cst_55 {dimension_numbers = #tpu.dot_dimension_numbers<[1], [0], [0], [1], [0, 0, 1, 1], [], []>} : vector<5x128xbf16>, vector<128x128xbf16>, vector<5x128xf32> -> vector<5x128xf32>
    %c3 = arith.constant 3 : index
    %c0_56 = arith.constant 0 : index
    %102 = vector.load %arg2[%c3, %c0_56] : memref<16x128xf32, #tpu.memory_space<vmem>>, vector<1x128xf32>
    %103 = vector.broadcast %102 : vector<1x128xf32> to vector<5x128xf32>
    %104 = arith.addf %101, %103 : vector<5x128xf32>
    %cst_57 = arith.constant 0.000000e+00 : f32
    %105 = vector.broadcast %cst_57 : f32 to vector<5x128xf32>
    %106 = arith.maximumf %104, %105 : vector<5x128xf32>
    %c1392 = arith.constant 1392 : index
    %c0_58 = arith.constant 0 : index
    %107 = vector.load %arg1[%c1392, %c0_58] : memref<2160x128xbf16, #tpu.memory_space<vmem>>, vector<128x128xbf16>
    %108 = arith.truncf %106 : vector<5x128xf32> to vector<5x128xbf16>
    %cst_59 = arith.constant dense<0.000000e+00> : vector<5x128xf32>
    %109 = tpu.matmul %108, %107, %cst_59 {dimension_numbers = #tpu.dot_dimension_numbers<[1], [0], [0], [1], [0, 0, 1, 1], [], []>} : vector<5x128xbf16>, vector<128x128xbf16>, vector<5x128xf32> -> vector<5x128xf32>
    %c4 = arith.constant 4 : index
    %c0_60 = arith.constant 0 : index
    %110 = vector.load %arg2[%c4, %c0_60] : memref<16x128xf32, #tpu.memory_space<vmem>>, vector<1x128xf32>
    %111 = vector.broadcast %110 : vector<1x128xf32> to vector<5x128xf32>
    %112 = arith.addf %109, %111 : vector<5x128xf32>
    %113 = arith.addf %112, %98 : vector<5x128xf32>
    %cst_61 = arith.constant 0.000000e+00 : f32
    %114 = vector.broadcast %cst_61 : f32 to vector<5x128xf32>
    %115 = arith.maximumf %113, %114 : vector<5x128xf32>
    %c1520 = arith.constant 1520 : index
    %c0_62 = arith.constant 0 : index
    %116 = vector.load %arg1[%c1520, %c0_62] : memref<2160x128xbf16, #tpu.memory_space<vmem>>, vector<128x64xbf16>
    %117 = arith.truncf %115 : vector<5x128xf32> to vector<5x128xbf16>
    %cst_63 = arith.constant dense<0.000000e+00> : vector<5x64xf32>
    %118 = tpu.matmul %117, %116, %cst_63 {dimension_numbers = #tpu.dot_dimension_numbers<[1], [0], [0], [1], [0, 0, 1, 1], [], []>} : vector<5x128xbf16>, vector<128x64xbf16>, vector<5x64xf32> -> vector<5x64xf32>
    %c5 = arith.constant 5 : index
    %c0_64 = arith.constant 0 : index
    %119 = vector.load %arg2[%c5, %c0_64] : memref<16x128xf32, #tpu.memory_space<vmem>>, vector<1x64xf32>
    %120 = vector.broadcast %119 : vector<1x64xf32> to vector<5x64xf32>
    %121 = arith.addf %118, %120 : vector<5x64xf32>
    %cst_65 = arith.constant 0.000000e+00 : f32
    %122 = vector.broadcast %cst_65 : f32 to vector<5x64xf32>
    %123 = arith.maximumf %121, %122 : vector<5x64xf32>
    %c1648 = arith.constant 1648 : index
    %c0_66 = arith.constant 0 : index
    %124 = vector.load %arg1[%c1648, %c0_66] : memref<2160x128xbf16, #tpu.memory_space<vmem>>, vector<64x64xbf16>
    %125 = arith.truncf %123 : vector<5x64xf32> to vector<5x64xbf16>
    %cst_67 = arith.constant dense<0.000000e+00> : vector<5x64xf32>
    %126 = tpu.matmul %125, %124, %cst_67 {dimension_numbers = #tpu.dot_dimension_numbers<[1], [0], [0], [1], [0, 0, 1, 1], [], []>} : vector<5x64xbf16>, vector<64x64xbf16>, vector<5x64xf32> -> vector<5x64xf32>
    %c6 = arith.constant 6 : index
    %c0_68 = arith.constant 0 : index
    %127 = vector.load %arg2[%c6, %c0_68] : memref<16x128xf32, #tpu.memory_space<vmem>>, vector<1x64xf32>
    %128 = vector.broadcast %127 : vector<1x64xf32> to vector<5x64xf32>
    %129 = arith.addf %126, %128 : vector<5x64xf32>
    %c1712 = arith.constant 1712 : index
    %c0_69 = arith.constant 0 : index
    %130 = vector.load %arg1[%c1712, %c0_69] : memref<2160x128xbf16, #tpu.memory_space<vmem>>, vector<128x64xbf16>
    %131 = arith.truncf %115 : vector<5x128xf32> to vector<5x128xbf16>
    %cst_70 = arith.constant dense<0.000000e+00> : vector<5x64xf32>
    %132 = tpu.matmul %131, %130, %cst_70 {dimension_numbers = #tpu.dot_dimension_numbers<[1], [0], [0], [1], [0, 0, 1, 1], [], []>} : vector<5x128xbf16>, vector<128x64xbf16>, vector<5x64xf32> -> vector<5x64xf32>
    %c7 = arith.constant 7 : index
    %c0_71 = arith.constant 0 : index
    %133 = vector.load %arg2[%c7, %c0_71] : memref<16x128xf32, #tpu.memory_space<vmem>>, vector<1x64xf32>
    %134 = vector.broadcast %133 : vector<1x64xf32> to vector<5x64xf32>
    %135 = arith.addf %132, %134 : vector<5x64xf32>
    %136 = arith.addf %129, %135 : vector<5x64xf32>
    %cst_72 = arith.constant 0.000000e+00 : f32
    %137 = vector.broadcast %cst_72 : f32 to vector<5x64xf32>
    %138 = arith.maximumf %136, %137 : vector<5x64xf32>
    %c1840 = arith.constant 1840 : index
    %c0_73 = arith.constant 0 : index
    %139 = vector.load %arg1[%c1840, %c0_73] : memref<2160x128xbf16, #tpu.memory_space<vmem>>, vector<64x64xbf16>
    %140 = arith.truncf %138 : vector<5x64xf32> to vector<5x64xbf16>
    %cst_74 = arith.constant dense<0.000000e+00> : vector<5x64xf32>
    %141 = tpu.matmul %140, %139, %cst_74 {dimension_numbers = #tpu.dot_dimension_numbers<[1], [0], [0], [1], [0, 0, 1, 1], [], []>} : vector<5x64xbf16>, vector<64x64xbf16>, vector<5x64xf32> -> vector<5x64xf32>
    %c8 = arith.constant 8 : index
    %c0_75 = arith.constant 0 : index
    %142 = vector.load %arg2[%c8, %c0_75] : memref<16x128xf32, #tpu.memory_space<vmem>>, vector<1x64xf32>
    %143 = vector.broadcast %142 : vector<1x64xf32> to vector<5x64xf32>
    %144 = arith.addf %141, %143 : vector<5x64xf32>
    %cst_76 = arith.constant 0.000000e+00 : f32
    %145 = vector.broadcast %cst_76 : f32 to vector<5x64xf32>
    %146 = arith.maximumf %144, %145 : vector<5x64xf32>
    %c1904 = arith.constant 1904 : index
    %c0_77 = arith.constant 0 : index
    %147 = vector.load %arg1[%c1904, %c0_77] : memref<2160x128xbf16, #tpu.memory_space<vmem>>, vector<64x64xbf16>
    %148 = arith.truncf %146 : vector<5x64xf32> to vector<5x64xbf16>
    %cst_78 = arith.constant dense<0.000000e+00> : vector<5x64xf32>
    %149 = tpu.matmul %148, %147, %cst_78 {dimension_numbers = #tpu.dot_dimension_numbers<[1], [0], [0], [1], [0, 0, 1, 1], [], []>} : vector<5x64xbf16>, vector<64x64xbf16>, vector<5x64xf32> -> vector<5x64xf32>
    %c9 = arith.constant 9 : index
    %c0_79 = arith.constant 0 : index
    %150 = vector.load %arg2[%c9, %c0_79] : memref<16x128xf32, #tpu.memory_space<vmem>>, vector<1x64xf32>
    %151 = vector.broadcast %150 : vector<1x64xf32> to vector<5x64xf32>
    %152 = arith.addf %149, %151 : vector<5x64xf32>
    %153 = arith.addf %152, %138 : vector<5x64xf32>
    %cst_80 = arith.constant 0.000000e+00 : f32
    %154 = vector.broadcast %cst_80 : f32 to vector<5x64xf32>
    %155 = arith.maximumf %153, %154 : vector<5x64xf32>
    %c1968 = arith.constant 1968 : index
    %c0_81 = arith.constant 0 : index
    %156 = vector.load %arg1[%c1968, %c0_81] : memref<2160x128xbf16, #tpu.memory_space<vmem>>, vector<64x64xbf16>
    %157 = arith.truncf %155 : vector<5x64xf32> to vector<5x64xbf16>
    %cst_82 = arith.constant dense<0.000000e+00> : vector<5x64xf32>
    %158 = tpu.matmul %157, %156, %cst_82 {dimension_numbers = #tpu.dot_dimension_numbers<[1], [0], [0], [1], [0, 0, 1, 1], [], []>} : vector<5x64xbf16>, vector<64x64xbf16>, vector<5x64xf32> -> vector<5x64xf32>
    %c10 = arith.constant 10 : index
    %c0_83 = arith.constant 0 : index
    %159 = vector.load %arg2[%c10, %c0_83] : memref<16x128xf32, #tpu.memory_space<vmem>>, vector<1x64xf32>
    %160 = vector.broadcast %159 : vector<1x64xf32> to vector<5x64xf32>
    %161 = arith.addf %158, %160 : vector<5x64xf32>
    %162 = math.tanh %161 : vector<5x64xf32>
    %c2032 = arith.constant 2032 : index
    %c0_84 = arith.constant 0 : index
    %163 = vector.load %arg1[%c2032, %c0_84] : memref<2160x128xbf16, #tpu.memory_space<vmem>>, vector<64x1xbf16>
    %164 = arith.truncf %162 : vector<5x64xf32> to vector<5x64xbf16>
    %cst_85 = arith.constant dense<0.000000e+00> : vector<5x1xf32>
    %165 = tpu.matmul %164, %163, %cst_85 {dimension_numbers = #tpu.dot_dimension_numbers<[1], [0], [0], [1], [0, 0, 1, 1], [], []>} : vector<5x64xbf16>, vector<64x1xbf16>, vector<5x1xf32> -> vector<5x1xf32>
    %c11 = arith.constant 11 : index
    %c0_86 = arith.constant 0 : index
    %166 = vector.load %arg2[%c11, %c0_86] : memref<16x128xf32, #tpu.memory_space<vmem>>, vector<1x1xf32>
    %167 = vector.broadcast %166 : vector<1x1xf32> to vector<5x1xf32>
    %168 = arith.addf %165, %167 : vector<5x1xf32>
    %cst_87 = arith.constant dense<0xFF800000> : vector<1xf32>
    %169 = vector.multi_reduction <maximumf>, %168, %cst_87 [0] : vector<5x1xf32> to vector<1xf32>
    %170 = vector.shape_cast %169 : vector<1xf32> to vector<1x1xf32>
    %171 = vector.broadcast %170 : vector<1x1xf32> to vector<5x1xf32>
    %172 = arith.subf %168, %171 : vector<5x1xf32>
    %173 = math.exp %172 : vector<5x1xf32>
    %cst_88 = arith.constant dense<0.000000e+00> : vector<1xf32>
    %174 = vector.multi_reduction <add>, %173, %cst_88 [0] : vector<5x1xf32> to vector<1xf32>
    %175 = vector.shape_cast %174 : vector<1xf32> to vector<1x1xf32>
    %176 = tpu.reciprocal %175 {approx = true} : vector<1x1xf32> -> vector<1x1xf32>
    %177 = vector.broadcast %176 : vector<1x1xf32> to vector<5x1xf32>
    %178 = arith.mulf %173, %177 : vector<5x1xf32>
    %179 = vector.broadcast %178 : vector<5x1xf32> to vector<5x64xf32>
    %180 = arith.mulf %179, %155 : vector<5x64xf32>
    %cst_89 = arith.constant dense<0.000000e+00> : vector<64xf32>
    %181 = vector.multi_reduction <add>, %180, %cst_89 [0] : vector<5x64xf32> to vector<64xf32>
    %182 = vector.shape_cast %181 : vector<64xf32> to vector<1x64xf32>
    %c2096 = arith.constant 2096 : index
    %c0_90 = arith.constant 0 : index
    %183 = vector.load %arg1[%c2096, %c0_90] : memref<2160x128xbf16, #tpu.memory_space<vmem>>, vector<64x6xbf16>
    %184 = arith.truncf %182 : vector<1x64xf32> to vector<1x64xbf16>
    %cst_91 = arith.constant dense<0.000000e+00> : vector<1x6xf32>
    %185 = tpu.matmul %184, %183, %cst_91 {dimension_numbers = #tpu.dot_dimension_numbers<[1], [0], [0], [1], [0, 0, 1, 1], [], []>} : vector<1x64xbf16>, vector<64x6xbf16>, vector<1x6xf32> -> vector<1x6xf32>
    %c12 = arith.constant 12 : index
    %c0_92 = arith.constant 0 : index
    %186 = vector.load %arg2[%c12, %c0_92] : memref<16x128xf32, #tpu.memory_space<vmem>>, vector<1x6xf32>
    %187 = arith.addf %185, %186 : vector<1x6xf32>
    %c0_93 = arith.constant 0 : index
    %c0_94 = arith.constant 0 : index
    %188 = vector.load %arg3[%c0_93, %c0_94] : memref<1x6xf32, #tpu.memory_space<vmem>>, vector<1x6xf32>
    tpu.vector_store %arg3[%c0_93, %c0_94], %187 {strides = array<i32>} : memref<1x6xf32, #tpu.memory_space<vmem>>, vector<1x6xf32>,
    return
  }
}

</mosaic_0001>

<bundles_post_ra>
// kernel: _lambda_.1
= control target key start
LH: loop header
LB: loop body
LE: loop exit
PB: predicated region body
PF: predicated region fallthrough
CT: control target
= control target key end

     0   :  { %v4315_v1 = vmov 0.0   ;;  %vm4316_vm0 = vmmov 0   ;;  %vm114_vm1 = vcmask 1044480   ;;  %vm98_vm2 = vcmask 736256   ;;  %s5223_s0 = inlined_call_operand.vmem [shape: bf16[90,54], index: 0, kind: input, shape index: {}]   ;;  %s5224_s1 = inlined_call_operand.vmem [shape: bf16[2160,128], index: 1, kind: input, shape index: {}]   ;;  %s5225_s2 = inlined_call_operand.vmem [shape: f32[16,128], index: 2, kind: input, shape index: {}]   ;;  %s5226_s3 = inlined_call_operand.hbm [shape: f32[1,6], index: 3, kind: output, shape index: {}]  }
   0x1   :  { %v4344_v0 = vld [vmem:[%s5223_s0] sm:$0xff]   ;;  %3549 = vmatprep.subr.bf16.mxu0 %v4315_v1  ;;  %3581 = vmatprep.subr.bf16.mxu1 %v4315_v1  ;;  %v4353_v2 = vld [vmem:[%s5223_s0 + $0x8] sm:$0xff]   ;;  %v4366_v3 = vld [vmem:[%s5223_s0 + $0x10] sm:$0xff]  }
   0x2   :  { %3550 = vmatpush3.bf16.msra.mxu0 %v4344_v0  ;;  %3582 = vmatpush3.bf16.msra.mxu1 %v4344_v0  ;;  %v4375_v4 = vld [vmem:[%s5223_s0 + $0x18] sm:$0xff]   ;;  %v4384_v5 = vld [vmem:[%s5223_s0 + $0x20] sm:$0xff]   ;;  %v4153_v6 = vld [vmem:[%s5223_s0 + $0x28] sm:$0x1f]  }
   0x3   :  { %3551 = vmatprep.subr.bf16.mxu0 %v4315_v1  ;;  %3583 = vmatprep.subr.bf16.mxu1 %v4315_v1  ;;  %v4395_v7 = vsel %vm114_vm1, %v4153_v6, 0  ;;  %v4154_v8 = vld [vmem:[%s5224_s1] sm:$0xff]   ;;  %v4155_v9 = vld [vmem:[%s5224_s1 + $0x48] sm:$0xff]   ;;  %v4164_v10 = vld [vmem:[%s5224_s1 + $0x70] sm:$0xff]  }
   0x4   :  { %3561 = vmatprep.mubr.msk.bf16.mxu0 %vm4316_vm0, %v4315_v1  ;;  %3593 = vmatprep.mubr.msk.bf16.mxu1 %vm4316_vm0, %v4315_v1  ;;  %v4166_v11 = vld [vmem:[%s5224_s1 + $0x28] sm:$0xff]   ;;  %v4165_v12 = vld [vmem:[%s5224_s1 + $0x78] sm:$0xff]   ;;  %v4168_v13 = vld [vmem:[%s5224_s1 + $0x30] sm:$0xff]  }
   0x5   :  { %v4156_v14 = vld [vmem:[%s5224_s1 + $0x8] sm:$0xff]   ;;  %v4157_v15 = vld [vmem:[%s5224_s1 + $0x50] sm:$0xff]   ;;  %v4167_v16 = vld [vmem:[%s5224_s1 + $0x80] sm:$0xff]  }
   0x6   :  { %3552 = vmatpush3.bf16.msra.mxu0 %v4353_v2  ;;  %3584 = vmatpush3.bf16.msra.mxu1 %v4353_v2  ;;  %v4169_v17 = vld [vmem:[%s5224_s1 + $0x38] sm:$0xff]   ;;  %v4158_v18 = vld [vmem:[%s5224_s1 + $0x10] sm:$0xff]   ;;  %v4161_v21 = vld [vmem:[%s5224_s1 + $0x60] sm:$0xff]  }
   0x7   :  { %3553 = vmatprep.subr.bf16.mxu0 %v4315_v1  ;;  %3585 = vmatprep.subr.bf16.mxu1 %v4315_v1  ;;  %v4159_v19 = vld [vmem:[%s5224_s1 + $0x58] sm:$0xff]   ;;  %v4162_v22 = vld [vmem:[%s5224_s1 + $0x20] sm:$0xff]   ;;  %v4163_v23 = vld [vmem:[%s5224_s1 + $0x68] sm:$0xff]  }
   0x8   :  { %v4160_v20 = vld [vmem:[%s5224_s1 + $0x18] sm:$0xff]  }
   0xa   :  { %3554 = vmatpush3.bf16.msra.mxu0 %v4366_v3  ;;  %3586 = vmatpush3.bf16.msra.mxu1 %v4366_v3 }
   0xb   :  { %3555 = vmatprep.subr.bf16.mxu0 %v4315_v1  ;;  %3587 = vmatprep.subr.bf16.mxu1 %v4315_v1 }
   0xe   :  { %3556 = vmatpush3.bf16.msra.mxu0 %v4375_v4  ;;  %3588 = vmatpush3.bf16.msra.mxu1 %v4375_v4 }
   0xf   :  { %3557 = vmatprep.subr.bf16.mxu0 %v4315_v1  ;;  %3589 = vmatprep.subr.bf16.mxu1 %v4315_v1 }
  0x12   :  { %3558 = vmatpush3.bf16.msra.mxu0 %v4384_v5  ;;  %3590 = vmatpush3.bf16.msra.mxu1 %v4384_v5 }
  0x13   :  { %3559 = vmatprep.subr.bf16.mxu0 %v4315_v1  ;;  %3591 = vmatprep.subr.bf16.mxu1 %v4315_v1 }
  0x16   :  { %3560 = vmatpush3.bf16.msra.mxu0 %v4395_v7  ;;  %3592 = vmatpush3.bf16.msra.mxu1 %v4395_v7 }
  0x17   :  { %3613 = vmatprep.subr.bf16.mxu0 %v4315_v1  ;;  %3641 = vmatprep.subr.bf16.mxu1 %v4315_v1 }
  0x19   :  { %3562 = vmatmul.mubr.msk.bf16.vlgmr.msra.gmra.mrb[0].mxu0 %vm98_vm2, %v4154_v8  ;;  %3594 = vmatmul.mubr.msk.bf16.vlgmr.msra.gmra.mrb[0].mxu1 %vm98_vm2, %v4155_v9 }
  0x1a   :  { %3565 = vmatprep.mubr.msk.bf16.mxu0 %vm4316_vm0, %v4315_v1  ;;  %3597 = vmatprep.mubr.msk.bf16.mxu1 %vm4316_vm0, %v4315_v1 }
  0x1b   :  { %3614 = vmatpush3.bf16.msra.mxu0 %v4164_v10  ;;  %3642 = vmatpush3.bf16.msra.mxu1 %v4166_v11 }
  0x1c   :  { %3615 = vmatprep.subr.bf16.mxu0 %v4315_v1  ;;  %3643 = vmatprep.subr.bf16.mxu1 %v4315_v1 }
  0x1f   :  { %3616 = vmatpush3.bf16.msra.mxu0 %v4165_v12  ;;  %3644 = vmatpush3.bf16.msra.mxu1 %v4168_v13 }
  0x20   :  { %3617 = vmatprep.subr.bf16.mxu0 %v4315_v1  ;;  %3645 = vmatprep.subr.bf16.mxu1 %v4315_v1 }
  0x21   :  { %3566 = vmatmul.mubr.msk.bf16.gmra.mrb[4].mxu0 %vm98_vm2, %v4156_v14  ;;  %3598 = vmatmul.mubr.msk.bf16.gmra.mrb[4].mxu1 %vm98_vm2, %v4157_v15 }
  0x22   :  { %3569 = vmatprep.mubr.msk.bf16.mxu0 %vm4316_vm0, %v4315_v1  ;;  %3601 = vmatprep.mubr.msk.bf16.mxu1 %vm4316_vm0, %v4315_v1 }
  0x23   :  { %3618 = vmatpush3.bf16.msra.mxu0 %v4167_v16  ;;  %3646 = vmatpush3.bf16.msra.mxu1 %v4169_v17 }
  0x24   :  { %3619 = vmatprep.subr.bf16.mxu0 %v4315_v1  ;;  %3647 = vmatprep.subr.bf16.mxu1 %v4315_v1 }
  0x29   :  { %3570 = vmatmul.mubr.msk.bf16.gmra.mrb[8].mxu0 %vm98_vm2, %v4158_v18  ;;  %3602 = vmatmul.mubr.msk.bf16.gmra.mrb[8].mxu1 %vm98_vm2, %v4159_v19 }
  0x2a   :  { %3573 = vmatprep.mubr.msk.bf16.mxu0 %vm4316_vm0, %v4315_v1  ;;  %3605 = vmatprep.mubr.msk.bf16.mxu1 %vm4316_vm0, %v4315_v1 }
  0x31   :  { %3574 = vmatmul.mubr.msk.bf16.gmra.mrb[12].mxu0 %vm98_vm2, %v4160_v20  ;;  %3606 = vmatmul.mubr.msk.bf16.gmra.mrb[12].mxu1 %vm98_vm2, %v4161_v21 }
  0x32   :  { %3577 = vmatprep.mubr.msk.bf16.mxu0 %vm4316_vm0, %v4315_v1  ;;  %3609 = vmatprep.mubr.msk.bf16.mxu1 %vm4316_vm0, %v4315_v1 }
  0x39   :  { %3578 = vmatmul.mubr.msk.bf16.gmra.mrb[16].mxu0 %vm98_vm2, %v4162_v22  ;;  %3610 = vmatmul.mubr.msk.bf16.gmra.mrb[16].mxu1 %vm98_vm2, %v4163_v23 }
  0x3a   :  { %3621 = vmatprep.mubr.msk.bf16.mxu0 %vm4316_vm0, %v4315_v1  ;;  %3649 = vmatprep.mubr.msk.bf16.mxu1 %vm4316_vm0, %v4315_v1 }
  0x3b   :  { %8 = vsyncpa [#allocation3], 0  ;;  %v4170_v24 = vld [vmem:[%s5224_s1 + $0x88] ss:$0 sps:$4 sm:$0x77]   ;;  %vm375_vm3 = vcmask 1042432  }
  0x3c   :  { %v4171_v25 = vld [vmem:[%s5224_s1 + $0x40] ss:$0 sps:$4 sm:$0x77]   ;;  %v377_v26 = vsel %vm375_vm3, %v4170_v24, 0  ;;  %vm359_vm4 = vcmask 441344   ;;  %v4172_v15 = vld [vmem:[%s5224_s1 + $0x90] sm:$0xff]  }
  0x3d   :  { %v489_v27 = vsel %vm375_vm3, %v4171_v25, 0  ;;  %3620 = vmatpush3.bf16.msra.mxu0 %v377_v26  ;;  %v4173_v16 = vld [vmem:[%s5224_s1 + $0x98] sm:$0xff]   ;;  %v4174_v17 = vld [vmem:[%s5224_s1 + $0xa0] sm:$0xff]   ;;  %v4175_v18 = vld [vmem:[%s5224_s1 + $0xa8] sm:$0xff]   ;;  %vm869_vm5 = vcmask 654336   ;;  %s4317_s24 = smov 64  }
  0x3e   :  { %3648 = vmatpush3.bf16.msra.mxu1 %v489_v27  ;;  %3669 = vmatprep.subr.bf16.mxu0 %v4315_v1  ;;  %v4176_v19 = vld [vmem:[%s5224_s1 + $0xb0] sm:$0xff]   ;;  %v4177_v20 = vld [vmem:[%s5224_s1 + $0xb8] sm:$0xff]   ;;  %v4178_v21 = vld [vmem:[%s5224_s1 + $0xc0] sm:$0xff]   ;;  %vm1185_vm6 = vcmask 326656   ;;  %vm1192_vm7 = vcmask 1043456   ;;  %vm1414_vm8 = vcmask 523264  }
  0x3f   :  { %3701 = vmatprep.subr.bf16.mxu1 %v4315_v1  ;;  %v4179_v22 = vld [vmem:[%s5224_s1 + $0xc8] sm:$0xff]   ;;  %v4180_v23 = vld [vmem:[%s5224_s1 + $0xd0] ss:$0 sps:$4 sm:$0x77]   ;;  %s4318_s17 = smov 96   ;;  %vm1503_vm9 = vcmask 1041408  }
  0x40   :  { %v736_v24 = vsel %vm375_vm3, %v4180_v23, 0  ;;  %vm1499_vm10 = vcmask 162816   ;;  %vm1613_vm11 = vcmask 261120   ;;  %vm2999_vm12 = vcmask 4096  }
  0x41   :  { %vm3025_vm13 = vcmask 520192   ;;  %vm3110_vm14 = vcmask 40960  }
  0xec   :  { %v152_v28 = vpop.f32.mrb[0].mxu0  ;;  %v287_v29 = vpop.f32.mrb[0].mxu1 }
  0xed   :  { %v3563_v30 = vpop.f32.mrb[1].mxu0  ;;  %v3595_v31 = vpop.f32.mrb[1].mxu1 }
  0xee   :  { %v155_v32 = vpop.f32.mrb[2].mxu0  ;;  %v290_v33 = vpop.f32.mrb[2].mxu1 }
  0xef   :  { %v198_v34 = vpack.c.bf16 %v155_v32, %v152_v28  ;;  %v333_v35 = vpack.c.bf16 %v290_v33, %v287_v29  ;;  %v3596_v36 = vpop.f32.mrb[3].mxu1  ;;  %v3564_v37 = vpop.f32.mrb[3].mxu0 }
  0xf1   :  { %3622 = vmatmul.mubr.msk.bf16.vlgmr.msra.gmra.mrb[20].mxu0 %vm359_vm4, %v333_v35  ;;  %3650 = vmatmul.mubr.msk.bf16.vlgmr.msra.gmra.mrb[20].mxu1 %vm359_vm4, %v198_v34 }
  0xf2   :  { %3625 = vmatprep.mubr.msk.bf16.mxu0 %vm4316_vm0, %v4315_v1  ;;  %3653 = vmatprep.mubr.msk.bf16.mxu1 %vm4316_vm0, %v4315_v1 }
  0xf3   :  { %3670 = vmatpush3.bf16.msra.mxu0 %v4344_v0  ;;  %3702 = vmatpush3.bf16.msra.mxu1 %v4177_v20 }
  0xf4   :  { %v160_v38 = vpop.f32.mrb[4].mxu0  ;;  %v295_v39 = vpop.f32.mrb[4].mxu1  ;;  %3671 = vmatprep.subr.bf16.mxu0 %v4315_v1  ;;  %3703 = vmatprep.subr.bf16.mxu1 %v4315_v1 }
  0xf5   :  { %v3567_v40 = vpop.f32.mrb[5].mxu0  ;;  %v3599_v41 = vpop.f32.mrb[5].mxu1 }
  0xf6   :  { %v163_v42 = vpop.f32.mrb[6].mxu0  ;;  %v298_v43 = vpop.f32.mrb[6].mxu1 }
  0xf7   :  { %v199_v44 = vpack.c.bf16 %v163_v42, %v160_v38  ;;  %v334_v45 = vpack.c.bf16 %v298_v43, %v295_v39  ;;  %v3600_v46 = vpop.f32.mrb[7].mxu1  ;;  %v3568_v47 = vpop.f32.mrb[7].mxu0  ;;  %3672 = vmatpush3.bf16.msra.mxu0 %v4353_v2  ;;  %3704 = vmatpush3.bf16.msra.mxu1 %v4178_v21 }
  0xf8   :  { %3673 = vmatprep.subr.bf16.mxu0 %v4315_v1  ;;  %3705 = vmatprep.subr.bf16.mxu1 %v4315_v1 }
  0xf9   :  { %3626 = vmatmul.mubr.msk.bf16.gmra.mrb[24].mxu0 %vm359_vm4, %v334_v45  ;;  %3654 = vmatmul.mubr.msk.bf16.gmra.mrb[24].mxu1 %vm359_vm4, %v199_v44 }
  0xfa   :  { %3629 = vmatprep.mubr.msk.bf16.mxu0 %vm4316_vm0, %v4315_v1  ;;  %3657 = vmatprep.mubr.msk.bf16.mxu1 %vm4316_vm0, %v4315_v1 }
  0xfb   :  { %3674 = vmatpush3.bf16.msra.mxu0 %v4366_v3  ;;  %3706 = vmatpush3.bf16.msra.mxu1 %v4179_v22 }
  0xfc   :  { %v168_v48 = vpop.f32.mrb[8].mxu0  ;;  %v303_v49 = vpop.f32.mrb[8].mxu1  ;;  %3675 = vmatprep.subr.bf16.mxu0 %v4315_v1  ;;  %3707 = vmatprep.subr.bf16.mxu1 %v4315_v1 }
  0xfd   :  { %v3571_v50 = vpop.f32.mrb[9].mxu0  ;;  %v3603_v51 = vpop.f32.mrb[9].mxu1 }
  0xfe   :  { %v171_v52 = vpop.f32.mrb[10].mxu0  ;;  %v306_v53 = vpop.f32.mrb[10].mxu1 }
  0xff   :  { %v200_v54 = vpack.c.bf16 %v171_v52, %v168_v48  ;;  %v335_v55 = vpack.c.bf16 %v306_v53, %v303_v49  ;;  %v3604_v56 = vpop.f32.mrb[11].mxu1  ;;  %v3572_v57 = vpop.f32.mrb[11].mxu0  ;;  %3676 = vmatpush3.bf16.msra.mxu0 %v4375_v4  ;;  %3708 = vmatpush3.bf16.msra.mxu1 %v736_v24 }
 0x100   :  { %3677 = vmatprep.subr.bf16.mxu0 %v4315_v1  ;;  %3751 = vmatprep.subr.bf16.mxu1 %v4315_v1 }
 0x101   :  { %3630 = vmatmul.mubr.msk.bf16.gmra.mrb[28].mxu0 %vm359_vm4, %v335_v55  ;;  %3658 = vmatmul.mubr.msk.bf16.gmra.mrb[28].mxu1 %vm359_vm4, %v200_v54 }
 0x102   :  { %3633 = vmatprep.mubr.msk.bf16.mxu0 %vm4316_vm0, %v4315_v1  ;;  %3661 = vmatprep.mubr.msk.bf16.mxu1 %vm4316_vm0, %v4315_v1 }
 0x103   :  { %3678 = vmatpush3.bf16.msra.mxu0 %v4384_v5 }
 0x104   :  { %v176_v58 = vpop.f32.mrb[12].mxu0  ;;  %v311_v59 = vpop.f32.mrb[12].mxu1  ;;  %3679 = vmatprep.subr.bf16.mxu0 %v4315_v1 }
 0x105   :  { %v3575_v60 = vpop.f32.mrb[13].mxu0  ;;  %v3607_v61 = vpop.f32.mrb[13].mxu1 }
 0x106   :  { %v179_v62 = vpop.f32.mrb[14].mxu0  ;;  %v314_v63 = vpop.f32.mrb[14].mxu1 }
 0x107   :  { %v201_v0 = vpack.c.bf16 %v179_v62, %v176_v58  ;;  %v336_v2 = vpack.c.bf16 %v314_v63, %v311_v59  ;;  %v3608_v3 = vpop.f32.mrb[15].mxu1  ;;  %v3576_v4 = vpop.f32.mrb[15].mxu0  ;;  %3680 = vmatpush3.bf16.msra.mxu0 %v4395_v7 }
 0x108   :  { %3729 = vmatprep.subr.bf16.mxu0 %v4315_v1 }
 0x109   :  { %3634 = vmatmul.mubr.msk.bf16.gmra.mrb[32].mxu0 %vm359_vm4, %v336_v2  ;;  %3662 = vmatmul.mubr.msk.bf16.gmra.mrb[32].mxu1 %vm359_vm4, %v201_v0 }
 0x10a   :  { %3637 = vmatprep.mubr.msk.bf16.mxu0 %vm4316_vm0, %v4315_v1  ;;  %3665 = vmatprep.mubr.msk.bf16.mxu1 %vm4316_vm0, %v4315_v1 }
 0x10c   :  { %v184_v5 = vpop.f32.mrb[16].mxu0  ;;  %v319_v6 = vpop.f32.mrb[16].mxu1 }
 0x10d   :  { %v3579_v8 = vpop.f32.mrb[17].mxu0  ;;  %v3611_v9 = vpop.f32.mrb[17].mxu1 }
 0x10e   :  { %v187_v10 = vpop.f32.mrb[18].mxu0  ;;  %v322_v11 = vpop.f32.mrb[18].mxu1 }
 0x10f   :  { %v202_v12 = vpack.c.bf16 %v187_v10, %v184_v5  ;;  %v337_v7 = vpack.c.bf16 %v322_v11, %v319_v6  ;;  %v3612_v13 = vpop.f32.mrb[19].mxu1  ;;  %v3580_v14 = vpop.f32.mrb[19].mxu0 }
 0x111   :  { %3638 = vmatmul.mubr.msk.bf16.gmra.mrb[36].mxu0 %vm359_vm4, %v337_v7  ;;  %3666 = vmatmul.mubr.msk.bf16.gmra.mrb[36].mxu1 %vm359_vm4, %v202_v12 }
 0x112   :  { %3681 = vmatprep.mubr.msk.bf16.mxu0 %vm4316_vm0, %v4315_v1  ;;  %3709 = vmatprep.mubr.msk.bf16.mxu1 %vm4316_vm0, %v4315_v1 }
 0x119   :  { %3682 = vmatmul.mubr.msk.bf16.vlgmr.msra.gmra.mrb[40].mxu0 %vm98_vm2, %v4172_v15 }
 0x11a   :  { %3685 = vmatprep.mubr.msk.bf16.mxu0 %vm4316_vm0, %v4315_v1 }
 0x121   :  { %3686 = vmatmul.mubr.msk.bf16.gmra.mrb[44].mxu0 %vm98_vm2, %v4173_v16 }
 0x122   :  { %3689 = vmatprep.mubr.msk.bf16.mxu0 %vm4316_vm0, %v4315_v1 }
 0x129   :  { %3690 = vmatmul.mubr.msk.bf16.gmra.mrb[48].mxu0 %vm98_vm2, %v4174_v17 }
 0x12a   :  { %3693 = vmatprep.mubr.msk.bf16.mxu0 %vm4316_vm0, %v4315_v1 }
 0x131   :  { %3694 = vmatmul.mubr.msk.bf16.gmra.mrb[52].mxu0 %vm98_vm2, %v4175_v18 }
 0x132   :  { %3697 = vmatprep.mubr.msk.bf16.mxu0 %vm4316_vm0, %v4315_v1 }
 0x139   :  { %3698 = vmatmul.mubr.msk.bf16.gmra.mrb[56].mxu0 %vm98_vm2, %v4176_v19 }
 0x13a   :  { %3739 = vmatprep.mubr.msk.bf16.mxu0 %vm4316_vm0, %v4315_v1 }
 0x1c4   :  { %v413_v25 = vpop.f32.mrb[20].mxu0  ;;  %v525_v26 = vpop.f32.mrb[20].mxu1 }
 0x1c5   :  { %v4584_v27 = vadd.f32 %v525_v26, %v413_v25  ;;  %v3623_v28 = vpop.f32.mrb[21].mxu0  ;;  %v3651_v29 = vpop.f32.mrb[21].mxu1 }
 0x1c6   :  { %v416_v30 = vpop.f32.mrb[22].mxu0  ;;  %v528_v31 = vpop.f32.mrb[22].mxu1 }
 0x1c7   :  { %v4586_v32 = vadd.f32 %v528_v31, %v416_v30  ;;  %v3624_v33 = vpop.f32.mrb[23].mxu0  ;;  %v3652_v34 = vpop.f32.mrb[23].mxu1 }
 0x1cc   :  { %v421_v35 = vpop.f32.mrb[24].mxu0  ;;  %v533_v36 = vpop.f32.mrb[24].mxu1 }
 0x1cd   :  { %v4588_v37 = vadd.f32 %v533_v36, %v421_v35  ;;  %v3627_v38 = vpop.f32.mrb[25].mxu0  ;;  %v3655_v39 = vpop.f32.mrb[25].mxu1 }
 0x1ce   :  { %v424_v40 = vpop.f32.mrb[26].mxu0  ;;  %v536_v41 = vpop.f32.mrb[26].mxu1 }
 0x1cf   :  { %v4590_v42 = vadd.f32 %v536_v41, %v424_v40  ;;  %v3628_v43 = vpop.f32.mrb[27].mxu0  ;;  %v3656_v44 = vpop.f32.mrb[27].mxu1  ;;  %v4622_v41 = vld [vmem:[%s5225_s2] ss:$0 sm:$0xff] }
 0x1d4   :  { %v429_v45 = vpop.f32.mrb[28].mxu0  ;;  %v541_v46 = vpop.f32.mrb[28].mxu1 }
 0x1d5   :  { %v4592_v47 = vadd.f32 %v541_v46, %v429_v45  ;;  %v3631_v48 = vpop.f32.mrb[29].mxu0  ;;  %v3659_v49 = vpop.f32.mrb[29].mxu1 }
 0x1d6   :  { %v432_v50 = vpop.f32.mrb[30].mxu0  ;;  %v544_v51 = vpop.f32.mrb[30].mxu1 }
 0x1d7   :  { %v4594_v52 = vadd.f32 %v544_v51, %v432_v50  ;;  %v3632_v53 = vpop.f32.mrb[31].mxu0  ;;  %v3660_v54 = vpop.f32.mrb[31].mxu1 }
 0x1dc   :  { %v437_v55 = vpop.f32.mrb[32].mxu0  ;;  %v549_v56 = vpop.f32.mrb[32].mxu1 }
 0x1dd   :  { %v4596_v57 = vadd.f32 %v549_v56, %v437_v55  ;;  %v3635_v58 = vpop.f32.mrb[33].mxu0  ;;  %v3663_v59 = vpop.f32.mrb[33].mxu1 }
 0x1de   :  { %v440_v60 = vpop.f32.mrb[34].mxu0  ;;  %v552_v61 = vpop.f32.mrb[34].mxu1 }
 0x1df   :  { %v4598_v62 = vadd.f32 %v552_v61, %v440_v60  ;;  %v3636_v63 = vpop.f32.mrb[35].mxu0  ;;  %v3664_v0 = vpop.f32.mrb[35].mxu1 }
 0x1e4   :  { %v445_v2 = vpop.f32.mrb[36].mxu0  ;;  %v557_v3 = vpop.f32.mrb[36].mxu1 }
 0x1e5   :  { %v4600_v4 = vadd.f32 %v557_v3, %v445_v2  ;;  %v3639_v5 = vpop.f32.mrb[37].mxu0  ;;  %v3667_v6 = vpop.f32.mrb[37].mxu1 }
 0x1e6   :  { %v448_v8 = vpop.f32.mrb[38].mxu0  ;;  %v560_v9 = vpop.f32.mrb[38].mxu1 }
 0x1e7   :  { %v4602_v10 = vadd.f32 %v560_v9, %v448_v8  ;;  %v3640_v11 = vpop.f32.mrb[39].mxu0  ;;  %v3668_v12 = vpop.f32.mrb[39].mxu1 }
 0x1ec   :  { %v648_v7 = vpop.f32.mrb[40].mxu0 }
 0x1ed   :  { %v3683_v13 = vpop.f32.mrb[41].mxu0 }
 0x1ee   :  { %v651_v14 = vpop.f32.mrb[42].mxu0 }
 0x1ef   :  { %v694_v15 = vpack.c.bf16 %v651_v14, %v648_v7  ;;  %v3684_v16 = vpop.f32.mrb[43].mxu0 }
 0x1f1   :  { %3710 = vmatmul.mubr.msk.bf16.vlgmr.msra.gmra.mrb[40].mxu1 %vm359_vm4, %v694_v15 }
 0x1f2   :  { %3713 = vmatprep.mubr.msk.bf16.mxu1 %vm4316_vm0, %v4315_v1 }
 0x1f4   :  { %v656_v17 = vpop.f32.mrb[44].mxu0 }
 0x1f5   :  { %v3687_v18 = vpop.f32.mrb[45].mxu0 }
 0x1f6   :  { %v659_v19 = vpop.f32.mrb[46].mxu0 }
 0x1f7   :  { %v695_v20 = vpack.c.bf16 %v659_v19, %v656_v17  ;;  %v3688_v21 = vpop.f32.mrb[47].mxu0 }
 0x1f9   :  { %3714 = vmatmul.mubr.msk.bf16.gmra.mrb[44].mxu1 %vm359_vm4, %v695_v20 }
 0x1fa   :  { %3717 = vmatprep.mubr.msk.bf16.mxu1 %vm4316_vm0, %v4315_v1 }
 0x1fc   :  { %v664_v22 = vpop.f32.mrb[48].mxu0 }
 0x1fd   :  { %v3691_v23 = vpop.f32.mrb[49].mxu0 }
 0x1fe   :  { %v667_v24 = vpop.f32.mrb[50].mxu0 }
 0x1ff   :  { %v696_v25 = vpack.c.bf16 %v667_v24, %v664_v22  ;;  %v3692_v26 = vpop.f32.mrb[51].mxu0 }
 0x201   :  { %3718 = vmatmul.mubr.msk.bf16.gmra.mrb[48].mxu1 %vm359_vm4, %v696_v25 }
 0x202   :  { %3721 = vmatprep.mubr.msk.bf16.mxu1 %vm4316_vm0, %v4315_v1 }
 0x204   :  { %v672_v28 = vpop.f32.mrb[52].mxu0 }
 0x205   :  { %v3695_v29 = vpop.f32.mrb[53].mxu0 }
 0x206   :  { %v675_v30 = vpop.f32.mrb[54].mxu0 }
 0x207   :  { %v697_v31 = vpack.c.bf16 %v675_v30, %v672_v28  ;;  %v3696_v33 = vpop.f32.mrb[55].mxu0 }
 0x209   :  { %3722 = vmatmul.mubr.msk.bf16.gmra.mrb[52].mxu1 %vm359_vm4, %v697_v31 }
 0x20a   :  { %3725 = vmatprep.mubr.msk.bf16.mxu1 %vm4316_vm0, %v4315_v1 }
 0x20c   :  { %v680_v34 = vpop.f32.mrb[56].mxu0 }
 0x20d   :  { %v3699_v35 = vpop.f32.mrb[57].mxu0 }
 0x20e   :  { %v683_v36 = vpop.f32.mrb[58].mxu0  ;;  %v4188_v35 = vld [vmem:[%s5224_s1 + $0x110] sm:$0xff]  }
 0x20f   :  { %v698_v38 = vpack.c.bf16 %v683_v36, %v680_v34  ;;  %v3700_v39 = vpop.f32.mrb[59].mxu0  ;;  %v4187_v34 = vld [vmem:[%s5224_s1 + $0x108] sm:$0xff]   ;;  %v4183_v36 = vld [vmem:[%s5224_s1 + $0xe0] sm:$0xff]  }
 0x210   :  { %v4189_v39 = vld [vmem:[%s5224_s1 + $0x118] sm:$0xff]  }
 0x211   :  { %3726 = vmatmul.mubr.msk.bf16.gmra.mrb[56].mxu1 %vm359_vm4, %v698_v38  ;;  %v4184_v38 = vld [vmem:[%s5224_s1 + $0xf8] sm:$0xff]  }
 0x212   :  { %3761 = vmatprep.mubr.msk.bf16.mxu1 %vm4316_vm0, %v4315_v1 }
 0x2c4   :  { %v772_v40 = vpop.f32.mrb[40].mxu1 }
 0x2c5   :  { %v811_v43 = vadd.f32 %v772_v40, %v4584_v27  ;;  %v3711_v44 = vpop.f32.mrb[41].mxu1  ;;  %v4190_v40 = vld [vmem:[%s5224_s1 + $0x120] sm:$0xff]  }
 0x2c6   :  { %v775_v45 = vpop.f32.mrb[42].mxu1  ;;  %v4191_v44 = vld [vmem:[%s5224_s1 + $0x128] sm:$0xff]  }
 0x2c7   :  { %v826_v46 = vadd.f32 %v4622_v41, %v811_v43  ;;  %v812_v48 = vadd.f32 %v775_v45, %v4586_v32  ;;  %v3712_v49 = vpop.f32.mrb[43].mxu1  ;;  %v4186_v43 = vld [vmem:[%s5224_s1 + $0x100] ss:$0 sps:$4 sm:$0xff]   ;;  %v4192_v45 = vld [vmem:[%s5224_s1 + $0x130] sm:$0xff]  }
 0x2c9   :  { %v827_v50 = vadd.f32 %v4622_v41, %v812_v48  ;;  %v836_v51 = vmax.f32 %v826_v46, 0.0  ;;  %v4193_v46 = vld [vmem:[%s5224_s1 + $0x138] sm:$0xff]   ;;  %v4194_v48 = vld [vmem:[%s5224_s1 + $0x140] sm:$0xff]  }
 0x2cb   :  { %v837_v53 = vmax.f32 %v827_v50, 0.0 }
 0x2cc   :  { %v780_v54 = vpop.f32.mrb[44].mxu1 }
 0x2cd   :  { %v851_v55 = vpack.c.bf16 %v837_v53, %v836_v51  ;;  %v813_v56 = vadd.f32 %v780_v54, %v4588_v37  ;;  %v3715_v58 = vpop.f32.mrb[45].mxu1 }
 0x2ce   :  { %v783_v59 = vpop.f32.mrb[46].mxu1 }
 0x2cf   :  { %v828_v60 = vadd.f32 %v4622_v41, %v813_v56  ;;  %v814_v27 = vadd.f32 %v783_v59, %v4590_v42  ;;  %v3716_v61 = vpop.f32.mrb[47].mxu1  ;;  %3730 = vmatpush3.bf16.msra.mxu0 %v851_v55  ;;  %3752 = vmatpush3.bf16.msra.mxu1 %v851_v55 }
 0x2d0   :  { %3731 = vmatprep.subr.bf16.mxu0 %v4315_v1  ;;  %3753 = vmatprep.subr.bf16.mxu1 %v4315_v1 }
 0x2d1   :  { %v829_v32 = vadd.f32 %v4622_v41, %v814_v27  ;;  %v838_v63 = vmax.f32 %v828_v60, 0.0 }
 0x2d3   :  { %v839_v0 = vmax.f32 %v829_v32, 0.0 }
 0x2d4   :  { %v788_v2 = vpop.f32.mrb[48].mxu1 }
 0x2d5   :  { %v852_v3 = vpack.c.bf16 %v839_v0, %v838_v63  ;;  %v815_v37 = vadd.f32 %v788_v2, %v4592_v47  ;;  %v3719_v5 = vpop.f32.mrb[49].mxu1 }
 0x2d6   :  { %v791_v6 = vpop.f32.mrb[50].mxu1 }
 0x2d7   :  { %v830_v8 = vadd.f32 %v4622_v41, %v815_v37  ;;  %v816_v42 = vadd.f32 %v791_v6, %v4594_v52  ;;  %v3720_v9 = vpop.f32.mrb[51].mxu1  ;;  %3732 = vmatpush3.bf16.msra.mxu0 %v852_v3  ;;  %3754 = vmatpush3.bf16.msra.mxu1 %v852_v3 }
 0x2d8   :  { %3733 = vmatprep.subr.bf16.mxu0 %v4315_v1  ;;  %3755 = vmatprep.subr.bf16.mxu1 %v4315_v1 }
 0x2d9   :  { %v831_v11 = vadd.f32 %v4622_v41, %v816_v42  ;;  %v840_v12 = vmax.f32 %v830_v8, 0.0 }
 0x2db   :  { %v841_v7 = vmax.f32 %v831_v11, 0.0 }
 0x2dc   :  { %v796_v13 = vpop.f32.mrb[52].mxu1 }
 0x2dd   :  { %v853_v14 = vpack.c.bf16 %v841_v7, %v840_v12  ;;  %v817_v47 = vadd.f32 %v796_v13, %v4596_v57  ;;  %v3723_v15 = vpop.f32.mrb[53].mxu1 }
 0x2de   :  { %v799_v16 = vpop.f32.mrb[54].mxu1 }
 0x2df   :  { %v832_v17 = vadd.f32 %v4622_v41, %v817_v47  ;;  %v818_v52 = vadd.f32 %v799_v16, %v4598_v62  ;;  %v3724_v18 = vpop.f32.mrb[55].mxu1  ;;  %3734 = vmatpush3.bf16.msra.mxu0 %v853_v14  ;;  %3756 = vmatpush3.bf16.msra.mxu1 %v853_v14 }
 0x2e0   :  { %3735 = vmatprep.subr.bf16.mxu0 %v4315_v1  ;;  %3757 = vmatprep.subr.bf16.mxu1 %v4315_v1 }
 0x2e1   :  { %v833_v19 = vadd.f32 %v4622_v41, %v818_v52  ;;  %v842_v20 = vmax.f32 %v832_v17, 0.0 }
 0x2e3   :  { %v843_v21 = vmax.f32 %v833_v19, 0.0 }
 0x2e4   :  { %v804_v22 = vpop.f32.mrb[56].mxu1 }
 0x2e5   :  { %v854_v23 = vpack.c.bf16 %v843_v21, %v842_v20  ;;  %v819_v57 = vadd.f32 %v804_v22, %v4600_v4  ;;  %v3727_v24 = vpop.f32.mrb[57].mxu1  ;;  %v4181_v4 = vld [vmem:[%s5224_s1 + $0xd8] sm:$0xff]  }
 0x2e6   :  { %v807_v25 = vpop.f32.mrb[58].mxu1 }
 0x2e7   :  { %v834_v26 = vadd.f32 %v4622_v41, %v819_v57  ;;  %v820_v62 = vadd.f32 %v807_v25, %v4602_v10  ;;  %v3728_v28 = vpop.f32.mrb[59].mxu1  ;;  %3736 = vmatpush3.bf16.msra.mxu0 %v854_v23  ;;  %3758 = vmatpush3.bf16.msra.mxu1 %v854_v23  ;;  %v4182_v10 = vld [vmem:[%s5224_s1 + $0xf0] sm:$0xff]  }
 0x2e8   :  { %3737 = vmatprep.subr.bf16.mxu0 %v4315_v1  ;;  %3759 = vmatprep.subr.bf16.mxu1 %v4315_v1 }
 0x2e9   :  { %v835_v29 = vadd.f32 %v4622_v41, %v820_v62  ;;  %v844_v30 = vmax.f32 %v834_v26, 0.0  ;;  %v4185_v41 = vld [vmem:[%s5224_s1 + $0xe8] ss:$0 sps:$4 sm:$0xff]  }
 0x2ea   :  { %v4195_v26 = vld [vmem:[%s5224_s1 + $0x148] sm:$0xff]  }
 0x2eb   :  { %v845_v31 = vmax.f32 %v835_v29, 0.0 }
 0x2ed   :  { %v855_v33 = vpack.c.bf16 %v845_v31, %v844_v30 }
 0x2ef   :  { %3738 = vmatpush3.bf16.msra.mxu0 %v855_v33  ;;  %3760 = vmatpush3.bf16.msra.mxu1 %v855_v33 }
 0x2f0   :  { %3773 = vmatprep.subr.bf16.mxu0 %v4315_v1 }
 0x2f2   :  { %3740 = vmatmul.mubr.msk.bf16.vlgmr.msra.gmra.mrb[60].mxu0 %vm869_vm5, %v4181_v4  ;;  %3762 = vmatmul.mubr.msk.bf16.vlgmr.msra.gmra.mrb[60].mxu1 %vm869_vm5, %v4182_v10 }
 0x2f3   :  { %3743 = vmatprep.mubr.msk.bf16.mxu0 %vm4316_vm0, %v4315_v1  ;;  %3765 = vmatprep.mubr.msk.bf16.mxu1 %vm4316_vm0, %v4315_v1 }
 0x2f4   :  { %3774 = vmatpush3.bf16.msra.mxu0 %v4187_v34 }
 0x2f5   :  { %3775 = vmatprep.subr.bf16.mxu0 %v4315_v1 }
 0x2f8   :  { %3776 = vmatpush3.bf16.msra.mxu0 %v4188_v35 }
 0x2f9   :  { %3777 = vmatprep.subr.bf16.mxu0 %v4315_v1 }
 0x2fa   :  { %3744 = vmatmul.mubr.msk.bf16.gmra.mrb[64].mxu0 %vm869_vm5, %v4183_v36  ;;  %3766 = vmatmul.mubr.msk.bf16.gmra.mrb[64].mxu1 %vm869_vm5, %v4184_v38 }
 0x2fb   :  { %3747 = vmatprep.mubr.msk.bf16.mxu0 %vm4316_vm0, %v4315_v1  ;;  %3769 = vmatprep.mubr.msk.bf16.mxu1 %vm4316_vm0, %v4315_v1 }
 0x2fc   :  { %3778 = vmatpush3.bf16.msra.mxu0 %v4189_v39 }
 0x2fd   :  { %3779 = vmatprep.subr.bf16.mxu0 %v4315_v1 }
 0x300   :  { %3780 = vmatpush3.bf16.msra.mxu0 %v4190_v40 }
 0x301   :  { %3781 = vmatprep.subr.bf16.mxu0 %v4315_v1 }
 0x302   :  { %3748 = vmatmul.mubr.msk.bf16.gmra.mrb[68].mxu0 %vm869_vm5, %v4185_v41  ;;  %3770 = vmatmul.mubr.msk.bf16.gmra.mrb[68].mxu1 %vm869_vm5, %v4186_v43 }
 0x303   :  { %3789 = vmatprep.mubr.msk.bf16.mxu0 %vm4316_vm0, %v4315_v1  ;;  %3807 = vmatprep.mubr.msk.bf16.mxu1 %vm1185_vm6, %v4195_v26 }
 0x304   :  { %3782 = vmatpush3.bf16.msra.mxu0 %v4191_v44 }
 0x305   :  { %3783 = vmatprep.subr.bf16.mxu0 %v4315_v1 }
 0x308   :  { %3784 = vmatpush3.bf16.msra.mxu0 %v4192_v45 }
 0x309   :  { %3785 = vmatprep.subr.bf16.mxu0 %v4315_v1 }
 0x30c   :  { %3786 = vmatpush3.bf16.msra.mxu0 %v4193_v46 }
 0x30d   :  { %3787 = vmatprep.subr.bf16.mxu0 %v4315_v1 }
 0x310   :  { %3788 = vmatpush3.bf16.msra.mxu0 %v4194_v48 }
 0x3c5   :  { %v913_v49 = vpop.f32.mrb[60].mxu0  ;;  %v996_v50 = vpop.f32.mrb[60].mxu1 }
 0x3c6   :  { %v1018_v51 = vmax.f32 %v913_v49, %v996_v50  ;;  %v3741_v53 = vpop.f32.mrb[61].mxu0  ;;  %v3763_v54 = vpop.f32.mrb[61].mxu1  ;;  %v4196_v49 = vld [vmem:[%s5224_s1 + $0x150] ss:$0 sps:$4 sm:$0x33]   ;;  %v4197_v50 = vld [vmem:[%s5224_s1 + $0x158] sm:$0xff]  }
 0x3c7   :  { %v916_v55 = vpop.f32.mrb[62].mxu0  ;;  %v999_v56 = vpop.f32.mrb[62].mxu1  ;;  %v4199_v53 = vld [vmem:[%s5224_s1 + $0x168] sm:$0xff]   ;;  %v4200_v54 = vld [vmem:[%s5224_s1 + $0x170] ss:$0 sps:$4 sm:$0x33]  }
 0x3c8   :  { %v1019_v58 = vmax.f32 %v916_v55, %v999_v56  ;;  %v3742_v59 = vpop.f32.mrb[63].mxu0  ;;  %v3764_v60 = vpop.f32.mrb[63].mxu1  ;;  %v4201_v55 = vld [vmem:[%s5224_s1 + $0x178] sm:$0xff]   ;;  %v4202_v56 = vld [vmem:[%s5224_s1 + $0x180] sm:$0xff]  }
 0x3c9   :  { %3831 = vmatprep.subr.bf16.mxu0 %v4201_v55  ;;  %v4204_v59 = vld [vmem:[%s5224_s1 + $0x190] sm:$0xff]  }
 0x3ca   :  { %v1039_v27 = vpack.c.bf16 %v1019_v58, %v1018_v51  ;;  %v4198_v51 = vld [vmem:[%s5224_s1 + $0x160] ss:$0 sps:$4 sm:$0x33]   ;;  %v4203_v58 = vld [vmem:[%s5224_s1 + $0x188] sm:$0xff]  }
 0x3cc   :  { %3790 = vmatmul.mubr.bf16.vlgmr.msra.gmra.mrb[72].mxu0 %v1039_v27 }
 0x3cd   :  { %v921_v61 = vpop.f32.mrb[64].mxu0  ;;  %v1004_v32 = vpop.f32.mrb[64].mxu1  ;;  %3793 = vmatprep.mubr.msk.bf16.mxu0 %vm4316_vm0, %v4315_v1  ;;  %3832 = vmatpush3.bf16.msra.mxu0 %v4201_v55 }
 0x3ce   :  { %v1020_v63 = vmax.f32 %v921_v61, %v1004_v32  ;;  %v3745_v0 = vpop.f32.mrb[65].mxu0  ;;  %v3767_v2 = vpop.f32.mrb[65].mxu1  ;;  %3833 = vmatprep.subr.bf16.mxu0 %v4202_v56 }
 0x3cf   :  { %v924_v3 = vpop.f32.mrb[66].mxu0  ;;  %v1007_v37 = vpop.f32.mrb[66].mxu1 }
 0x3d0   :  { %v1021_v5 = vmax.f32 %v924_v3, %v1007_v37  ;;  %v3746_v6 = vpop.f32.mrb[67].mxu0  ;;  %v3768_v8 = vpop.f32.mrb[67].mxu1 }
 0x3d1   :  { %3834 = vmatpush3.bf16.msra.mxu0 %v4202_v56 }
 0x3d2   :  { %v1040_v42 = vpack.c.bf16 %v1021_v5, %v1020_v63  ;;  %3835 = vmatprep.subr.bf16.mxu0 %v4203_v58 }
 0x3d4   :  { %3794 = vmatmul.mubr.bf16.gmra.mrb[76].mxu0 %v1040_v42 }
 0x3d5   :  { %v929_v9 = vpop.f32.mrb[68].mxu0  ;;  %v1012_v11 = vpop.f32.mrb[68].mxu1  ;;  %3797 = vmatprep.mubr.msk.bf16.mxu0 %vm4316_vm0, %v4315_v1  ;;  %3836 = vmatpush3.bf16.msra.mxu0 %v4203_v58 }
 0x3d6   :  { %v1022_v12 = vmax.f32 %v929_v9, %v1012_v11  ;;  %v3749_v7 = vpop.f32.mrb[69].mxu0  ;;  %v3771_v13 = vpop.f32.mrb[69].mxu1  ;;  %3837 = vmatprep.subr.bf16.mxu0 %v4204_v59 }
 0x3d7   :  { %v932_v14 = vpop.f32.mrb[70].mxu0  ;;  %v1015_v47 = vpop.f32.mrb[70].mxu1 }
 0x3d8   :  { %v1041_v15 = vpack.c.bf16 %v1022_v12, %v1022_v12  ;;  %v3750_v16 = vpop.f32.mrb[71].mxu0  ;;  %v3772_v17 = vpop.f32.mrb[71].mxu1 }
 0x3d9   :  { %3838 = vmatpush3.bf16.msra.mxu0 %v4204_v59 }
 0x3da   :  { %3851 = vmatprep.subr.bf16.mxu0 %v4315_v1 }
 0x3dc   :  { %3798 = vmatmul.mubr.bf16.gmra.mrb[80].mxu0 %v1041_v15 }
 0x49f   :  { %v1124_v52 = vpop.f32.mrb[72].mxu0 }
 0x4a0   :  { %v3791_v18 = vpop.f32.mrb[73].mxu0 }
 0x4a1   :  { %v1127_v19 = vpop.f32.mrb[74].mxu0 }
 0x4a2   :  { %v3792_v20 = vpop.f32.mrb[75].mxu0  ;;  %v4126_v21 = vpack.i.bf16 %v1127_v19, %v1124_v52 }
 0x4a4   :  { %4127 = vrot.lane.b32.xlu0 %v4126_v21, %s4317_s24 }
 0x4a7   :  { %v1132_v22 = vpop.f32.mrb[76].mxu0 }
 0x4a8   :  { %v3795_v23 = vpop.f32.mrb[77].mxu0 }
 0x4a9   :  { %v1135_v57 = vpop.f32.mrb[78].mxu0 }
 0x4aa   :  { %v4131_v24 = vpack.i.bf16 %v1135_v57, %v1132_v22  ;;  %v3796_v25 = vpop.f32.mrb[79].mxu0 }
 0x4ac   :  { %4132 = vrot.lane.b32.xlu0 %v4131_v24, %s4317_s24 }
 0x4af   :  { %v1140_v62 = vpop.f32.mrb[80].mxu0 }
 0x4b0   :  { %1159 = vrot.lane.b32.xlu1 %v1140_v62, %s4317_s24  ;;  %v3799_v28 = vpop.f32.mrb[81].mxu0 }
 0x4b1   :  { %v1143_v29 = vpop.f32.mrb[82].mxu0 }
 0x4b2   :  { %v3800_v30 = vpop.f32.mrb[83].mxu0 }
 0x516   :  { %v4128_v31 = vpop.permute.xlu0 %4127 }
 0x517   :  { %v4130_v33 = vunpack.i.h.bf16 %v4128_v31  ;;  %v4129_v4 = vunpack.i.l.bf16 %v4128_v31 }
 0x519   :  { %v1167_v10 = vmax.f32 %v1127_v19, %v4130_v33  ;;  %v1166_v34 = vmax.f32 %v1124_v52, %v4129_v4 }
 0x51b   :  { %v1174_v35 = vpack.c.bf16 %v1167_v10, %v1166_v34  ;;  %v1552_v34 = vld [vmem:[%s5224_s1 + $0x1b0] sm:$0x7] }
 0x51d   :  { %3801 = vmatprep.subr.bf16.mxu1 %v1174_v35 }
 0x51e   :  { %3802 = vmatpush3.bf16.msra.mxu1 %v1174_v35  ;;  %v4133_v36 = vpop.permute.xlu0 %4132 }
 0x51f   :  { %v4135_v38 = vunpack.i.h.bf16 %v4133_v36  ;;  %v4134_v39 = vunpack.i.l.bf16 %v4133_v36  ;;  %v4205_v36 = vld [vmem:[%s5224_s1 + $0x1b8] sm:$0xff]  }
 0x521   :  { %v1169_v40 = vmax.f32 %v1135_v57, %v4135_v38  ;;  %v1168_v41 = vmax.f32 %v1132_v22, %v4134_v39  ;;  %v1712_v38 = vld [vmem:[%s5224_s1 + $0x1c8] sm:$0x7]  ;;  %v1817_v39 = vld [vmem:[%s5224_s1 + $0x1e0] sm:$0x7] }
 0x522   :  { %v1160_v43 = vpop.permute.xlu1 %1159 }
 0x523   :  { %v1175_v44 = vpack.c.bf16 %v1169_v40, %v1168_v41  ;;  %v1170_v45 = vmax.f32 %v1140_v62, %v1160_v43  ;;  %v4206_v40 = vld [vmem:[%s5224_s1 + $0x1c0] sm:$0xff]   ;;  %v4213_v41 = vld [vmem:[%s5224_s1 + $0x1f8] sm:$0xff]  }
 0x524   :  { %v4214_v43 = vld [vmem:[%s5224_s1 + $0x200] sm:$0xff]  }
 0x525   :  { %v1176_v46 = vpack.c.bf16 %v1170_v45, %v1170_v45  ;;  %3803 = vmatprep.subr.bf16.mxu1 %v1175_v44  ;;  %v4216_v45 = vld [vmem:[%s5224_s1 + $0x210] sm:$0xff]  }
 0x526   :  { %3804 = vmatpush3.bf16.msra.mxu1 %v1175_v44 }
 0x527   :  { %4117 = vmatprep.subr.msk.bf16.mxu1 %vm1192_vm7, %v1176_v46  ;;  %v1194_v48 = vsel %vm1192_vm7, %v1176_v46, 0 }
 0x52a   :  { %3806 = vmatpush3.bf16.msra.mxu1 %v1194_v48 }
 0x52b   :  { %3811 = vmatprep.subr.bf16.mxu1 %v1174_v35 }
 0x52d   :  { %3808 = vmatmul.mubr.msk.bf16.vlgmr.msra.gmra.mrb[72].mxu1 %vm1185_vm6, %v4196_v49  ;;  %v4219_v49 = vld [vmem:[%s5224_s1 + $0x228] sm:$0xff]  }
 0x52e   :  { %3812 = vmatpush3.bf16.msra.mxu1 %v1174_v35  ;;  %3817 = vmatprep.mubr.msk.bf16.mxu1 %vm1185_vm6, %v4197_v50 }
 0x52f   :  { %3813 = vmatprep.subr.bf16.mxu1 %v1175_v44 }
 0x532   :  { %3814 = vmatpush3.bf16.msra.mxu1 %v1175_v44 }
 0x533   :  { %4118 = vmatprep.subr.msk.bf16.mxu1 %vm1192_vm7, %v1176_v46 }
 0x536   :  { %3816 = vmatpush3.bf16.msra.mxu1 %v1194_v48 }
 0x537   :  { %3821 = vmatprep.subr.bf16.mxu1 %v1174_v35 }
 0x539   :  { %3818 = vmatmul.mubr.msk.bf16.vlgmr.msra.gmra.mrb[76].mxu1 %vm1185_vm6, %v4198_v51  ;;  %v4207_v51 = vld [vmem:[%s5224_s1 + $0x1a0] sm:$0xff]  }
 0x53a   :  { %3822 = vmatpush3.bf16.msra.mxu1 %v1174_v35  ;;  %3827 = vmatprep.mubr.msk.bf16.mxu1 %vm1185_vm6, %v4199_v53  ;;  %v1496_v35 = vld [vmem:[%s5224_s1 + $0x198] sm:$0x7] }
 0x53b   :  { %3823 = vmatprep.subr.bf16.mxu1 %v1175_v44 }
 0x53e   :  { %3824 = vmatpush3.bf16.msra.mxu1 %v1175_v44  ;;  %v4215_v44 = vld [vmem:[%s5224_s1 + $0x208] sm:$0xff]  }
 0x53f   :  { %4119 = vmatprep.subr.msk.bf16.mxu1 %vm1192_vm7, %v1176_v46  ;;  %v4217_v46 = vld [vmem:[%s5224_s1 + $0x218] sm:$0xff]  }
 0x542   :  { %3826 = vmatpush3.bf16.msra.mxu1 %v1194_v48  ;;  %v4218_v48 = vld [vmem:[%s5224_s1 + $0x220] sm:$0xff]  }
 0x543   :  { %3843 = vmatprep.subr.bf16.mxu1 %v4315_v1 }
 0x545   :  { %3828 = vmatmul.mubr.msk.bf16.vlgmr.msra.gmra.mrb[80].mxu1 %vm1185_vm6, %v4200_v54 }
 0x546   :  { %3847 = vmatprep.mubr.msk.bf16.mxu1 %vm4316_vm0, %v4315_v1 }
 0x600   :  { %v3809_v60 = vpop.f32.mrb[72].mxu1 }
 0x601   :  { %v1230_v27 = vpop.f32.mrb[73].mxu1 }
 0x602   :  { %v3810_v61 = vpop.f32.mrb[74].mxu1 }
 0x603   :  { %v1233_v32 = vpop.f32.mrb[75].mxu1  ;;  %v4208_v61 = vld [vmem:[%s5224_s1 + $0x1a8] sm:$0xff]  }
 0x60c   :  { %v3819_v63 = vpop.f32.mrb[76].mxu1 }
 0x60d   :  { %v1311_v0 = vmax.f32 %v3809_v60, %v3819_v63  ;;  %v1295_v2 = vpop.f32.mrb[77].mxu1 }
 0x60e   :  { %v1309_v3 = vmax.f32 %v1230_v27, %v1295_v2  ;;  %v3820_v37 = vpop.f32.mrb[78].mxu1 }
 0x60f   :  { %v1298_v5 = vpop.f32.mrb[79].mxu1  ;;  %v4209_v37 = vld [vmem:[%s5224_s1 + $0x1d0] sm:$0xff]  }
 0x610   :  { %v1310_v6 = vmax.f32 %v1233_v32, %v1298_v5  ;;  %v4210_v5 = vld [vmem:[%s5224_s1 + $0x1d8] sm:$0xff]  }
 0x618   :  { %v3829_v8 = vpop.f32.mrb[80].mxu1 }
 0x619   :  { %v1379_v42 = vmax.f32 %v1311_v0, %v3829_v8  ;;  %v1363_v9 = vpop.f32.mrb[81].mxu1 }
 0x61a   :  { %v1377_v11 = vmax.f32 %v1309_v3, %v1363_v9  ;;  %v3830_v12 = vpop.f32.mrb[82].mxu1 }
 0x61b   :  { %v1366_v7 = vpop.f32.mrb[83].mxu1  ;;  %v1389_v47 = vpack.c.bf16 %v1379_v42, %v1379_v42  ;;  %v4211_v12 = vld [vmem:[%s5224_s1 + $0x1e8] sm:$0xff]  }
 0x61c   :  { %v1378_v13 = vmax.f32 %v1310_v6, %v1366_v7  ;;  %v4212_v7 = vld [vmem:[%s5224_s1 + $0x1f0] sm:$0xff]  }
 0x61e   :  { %v1388_v14 = vpack.c.bf16 %v1378_v13, %v1377_v11 }
 0x620   :  { %3839 = vmatprep.mubr.msk.bf16.mxu0 %vm1414_vm8, %v1388_v14  ;;  %v4220_v14 = vld [vmem:[%s5224_s1 + $0x230] sm:$0xff]  }
 0x621   :  { %3840 = vmatmul.mubr.msk.bf16.vlgmr.msra.gmra.mrb[84].mxu0 %vm1414_vm8, %v1389_v47  ;;  %v4221_v47 = vld [vmem:[%s5224_s1 + $0x238] sm:$0xff]  }
 0x622   :  { %3855 = vmatprep.mubr.msk.bf16.mxu0 %vm4316_vm0, %v4315_v1 }
 0x6f4   :  { %v3841_v15 = vpop.f32.mrb[84].mxu0 }
 0x6f5   :  { %v1455_v16 = vpop.f32.mrb[85].mxu0 }
 0x6f6   :  { %v3842_v17 = vpop.f32.mrb[86].mxu0 }
 0x6f7   :  { %v1458_v52 = vpop.f32.mrb[87].mxu0  ;;  %v4224_v17 = vld [vmem:[%s5224_s1 + $0x250] sm:$0xff]  }
 0x6f8   :  { %v4141_v18 = vpack.i.bf16 %v1458_v52, %v1455_v16 }
 0x6fa   :  { %4142 = vrot.lane.b32.xlu0 %v4141_v18, %s4317_s24  ;;  %4137 = vrot.lane.b32.xlu1 %v4141_v18, %s4318_s17  ;;  %v4226_v18 = vld [vmem:[%s5224_s1 + $0x260] sm:$0xff]  }
 0x6fe   :  { %1488 = vrot.lane.b32.xlu0 %v3841_v15, %s4317_s24  ;;  %1476 = vrot.lane.b32.xlu1 %v3841_v15, %s4318_s17 }
 0x76c   :  { %v4143_v19 = vpop.permute.xlu0 %4142  ;;  %v4138_v20 = vpop.permute.xlu1 %4137 }
 0x76d   :  { %v4140_v21 = vunpack.i.h.bf16 %v4138_v20  ;;  %v4139_v22 = vunpack.i.l.bf16 %v4138_v20  ;;  %v4145_v23 = vunpack.i.h.bf16 %v4143_v19  ;;  %v4144_v57 = vunpack.i.l.bf16 %v4143_v19 }
 0x76f   :  { %v1482_v24 = vmax.f32 %v1458_v52, %v4140_v21  ;;  %v1481_v25 = vmax.f32 %v1455_v16, %v4139_v22  ;;  %v4223_v16 = vld [vmem:[%s5224_s1 + $0x248] sm:$0xff]   ;;  %v4225_v52 = vld [vmem:[%s5224_s1 + $0x258] sm:$0xff]  }
 0x770   :  { %v1477_v26 = vpop.permute.xlu1 %1476  ;;  %v1489_v30 = vpop.permute.xlu0 %1488 }
 0x771   :  { %v1494_v62 = vmax.f32 %v1482_v24, %v4145_v23  ;;  %v1493_v28 = vmax.f32 %v1481_v25, %v4144_v57  ;;  %v1483_v29 = vmax.f32 %v3841_v15, %v1477_v26  ;;  %v4222_v15 = vld [vmem:[%s5224_s1 + $0x240] sm:$0xff]   ;;  %v4227_v57 = vld [vmem:[%s5224_s1 + $0x268] sm:$0xff]   ;;  %v4228_v24 = vld [vmem:[%s5224_s1 + $0x270] sm:$0xff]  }
 0x772   :  { %v4229_v25 = vld [vmem:[%s5224_s1 + $0x278] sm:$0xff]   ;;  %v4230_v26 = vld [vmem:[%s5224_s1 + $0x280] sm:$0xff]  }
 0x773   :  { %v1495_v31 = vmax.f32 %v1483_v29, %v1489_v30  ;;  %v1497_v33 = vpack.c.bf16 %v1494_v62, %v1493_v28  ;;  %v4231_v62 = vld [vmem:[%s5224_s1 + $0x288] sm:$0xff]   ;;  %v4232_v28 = vld [vmem:[%s5224_s1 + $0x290] sm:$0xff]   ;;  %v4233_v29 = vld [vmem:[%s5224_s1 + $0x298] sm:$0xff]  }
 0x774   :  { %v4234_v30 = vld [vmem:[%s5224_s1 + $0x2a0] sm:$0xff]  }
 0x775   :  { %v1498_v4 = vpack.c.bf16 %v1495_v31, %v1495_v31  ;;  %3844 = vmatpush3.bf16.msra.mxu1 %v1497_v33  ;;  %3852 = vmatpush3.bf16.msra.mxu0 %v1497_v33  ;;  %v3244_v31 = vld [vmem:[%s5225_s2 + $0x1] ss:$0 sm:$0xff] }
 0x776   :  { %3845 = vmatprep.subr.bf16.mxu1 %v4315_v1  ;;  %3853 = vmatprep.subr.bf16.mxu0 %v4315_v1 }
 0x777   :  { %v1505_v10 = vsel %vm1503_vm9, %v1498_v4, 0 }
 0x779   :  { %3846 = vmatpush3.bf16.msra.mxu1 %v1505_v10  ;;  %3854 = vmatpush3.bf16.msra.mxu0 %v1505_v10 }
 0x77a   :  { %3875 = vmatprep.subr.bf16.mxu0 %v4315_v1  ;;  %3859 = vmatprep.subr.bf16.mxu1 %v4315_v1 }
 0x77c   :  { %3856 = vmatmul.mubr.msk.bf16.vlgmr.msra.gmra.mrb[88].mxu0 %vm1499_vm10, %v1552_v34  ;;  %3848 = vmatmul.mubr.msk.bf16.vlgmr.msra.gmra.mrb[84].mxu1 %vm1499_vm10, %v1496_v35 }
 0x77d   :  { %3876 = vmatpush3.bf16.msra.mxu0 %v1497_v33  ;;  %3879 = vmatprep.mubr.msk.bf16.mxu0 %vm4316_vm0, %v4315_v1 }
 0x77e   :  { %3877 = vmatprep.subr.bf16.mxu0 %v4315_v1  ;;  %3860 = vmatpush3.bf16.msra.mxu1 %v4205_v36 }
 0x77f   :  { %3861 = vmatprep.subr.bf16.mxu1 %v4315_v1  ;;  %3863 = vmatprep.mubr.msk.bf16.mxu1 %vm4316_vm0, %v4315_v1 }
 0x781   :  { %3878 = vmatpush3.bf16.msra.mxu0 %v1505_v10 }
 0x782   :  { %3891 = vmatprep.subr.bf16.mxu0 %v4315_v1  ;;  %3862 = vmatpush3.bf16.msra.mxu1 %v4206_v40  ;;  %v4236_v40 = vld [vmem:[%s5224_s1 + $0x2b0] sm:$0xff]  }
 0x783   :  { %3867 = vmatprep.subr.bf16.mxu1 %v4315_v1 }
 0x784   :  { %3880 = vmatmul.mubr.msk.bf16.vlgmr.msra.gmra.mrb[92].mxu0 %vm1499_vm10, %v1712_v38 }
 0x785   :  { %3892 = vmatpush3.bf16.msra.mxu0 %v1497_v33  ;;  %3895 = vmatprep.mubr.msk.bf16.mxu0 %vm4316_vm0, %v4315_v1 }
 0x786   :  { %3893 = vmatprep.subr.bf16.mxu0 %v4315_v1 }
 0x789   :  { %3894 = vmatpush3.bf16.msra.mxu0 %v1505_v10 }
 0x78a   :  { %3907 = vmatprep.subr.bf16.mxu0 %v4315_v1 }
 0x78c   :  { %3896 = vmatmul.mubr.msk.bf16.vlgmr.msra.gmra.mrb[96].mxu0 %vm1499_vm10, %v1817_v39  ;;  %v4235_v39 = vld [vmem:[%s5224_s1 + $0x2a8] sm:$0xff]  }
 0x78d   :  { %3923 = vmatprep.mubr.msk.bf16.mxu0 %vm4316_vm0, %v4315_v1  ;;  %3908 = vmatpush3.bf16.msra.mxu0 %v4213_v41  ;;  %v4237_v41 = vld [vmem:[%s5224_s1 + $0x2b8] sm:$0xff]  }
 0x78e   :  { %3909 = vmatprep.subr.bf16.mxu0 %v4315_v1 }
 0x791   :  { %3910 = vmatpush3.bf16.msra.mxu0 %v4214_v43  ;;  %v4238_v43 = vld [vmem:[%s5224_s1 + $0x2c0] sm:$0xff]  }
 0x792   :  { %3911 = vmatprep.subr.bf16.mxu0 %v4315_v1 }
 0x795   :  { %3912 = vmatpush3.bf16.msra.mxu0 %v4215_v44  ;;  %v4239_v44 = vld [vmem:[%s5224_s1 + $0x2c8] sm:$0xff]  }
 0x796   :  { %3913 = vmatprep.subr.bf16.mxu0 %v4315_v1 }
 0x799   :  { %3914 = vmatpush3.bf16.msra.mxu0 %v4216_v45  ;;  %v4240_v45 = vld [vmem:[%s5224_s1 + $0x2d0] sm:$0xff]  }
 0x79a   :  { %3915 = vmatprep.subr.bf16.mxu0 %v4315_v1 }
 0x79d   :  { %3916 = vmatpush3.bf16.msra.mxu0 %v4217_v46  ;;  %v4241_v46 = vld [vmem:[%s5224_s1 + $0x2d8] sm:$0xff]  }
 0x79e   :  { %3917 = vmatprep.subr.bf16.mxu0 %v4315_v1 }
 0x7a1   :  { %3918 = vmatpush3.bf16.msra.mxu0 %v4218_v48  ;;  %v4242_v48 = vld [vmem:[%s5224_s1 + $0x2e0] sm:$0xff]  }
 0x7a2   :  { %3919 = vmatprep.subr.bf16.mxu0 %v4315_v1 }
 0x7a5   :  { %3920 = vmatpush3.bf16.msra.mxu0 %v4219_v49  ;;  %v3253_v49 = vld [vmem:[%s5225_s2 + $0x2] ss:$0 sm:$0xff] }
 0x7a6   :  { %3921 = vmatprep.subr.bf16.mxu0 %v4315_v1 }
 0x7a9   :  { %3922 = vmatpush3.bf16.msra.mxu0 %v4220_v14  ;;  %v4253_v14 = vld [vmem:[%s5224_s1 + $0x338] sm:$0xff]  }
 0x7aa   :  { %3947 = vmatprep.subr.bf16.mxu0 %v4315_v1 }
 0x84f   :  { %v1590_v50 = vpop.f32.mrb[88].mxu0  ;;  %v1541_v53 = vpop.f32.mrb[84].mxu1 }
 0x850   :  { %v1600_v54 = vpack.c.bf16 %v1590_v50, %v1590_v50  ;;  %v3857_v55 = vpop.f32.mrb[89].mxu0  ;;  %v3849_v56 = vpop.f32.mrb[85].mxu1  ;;  %v1551_v2 = vpack.c.bf16 %v1541_v53, %v1541_v53 }
 0x851   :  { %v1593_v58 = vpop.f32.mrb[90].mxu0  ;;  %v1544_v59 = vpop.f32.mrb[86].mxu1 }
 0x852   :  { %3864 = vmatmul.mubr.msk.bf16.vlgmr.msra.gmra.mrb[88].mxu1 %vm1613_vm11, %v1600_v54  ;;  %v3858_v60 = vpop.f32.mrb[91].mxu0  ;;  %v3850_v27 = vpop.f32.mrb[87].mxu1 }
 0x853   :  { %3868 = vmatpush3.bf16.msra.mxu1 %v4207_v51  ;;  %3871 = vmatprep.mubr.msk.bf16.mxu1 %vm4316_vm0, %v4315_v1  ;;  %v4243_v60 = vld [vmem:[%s5224_s1 + $0x2e8] sm:$0xff]   ;;  %v4244_v27 = vld [vmem:[%s5224_s1 + $0x2f0] sm:$0xff]  }
 0x854   :  { %3869 = vmatprep.subr.bf16.mxu1 %v4315_v1 }
 0x857   :  { %3870 = vmatpush3.bf16.msra.mxu1 %v4208_v61  ;;  %v1750_v32 = vpop.f32.mrb[92].mxu0  ;;  %v4245_v61 = vld [vmem:[%s5224_s1 + $0x2f8] sm:$0xff]  }
 0x858   :  { %3883 = vmatprep.subr.bf16.mxu1 %v4315_v1  ;;  %v3881_v63 = vpop.f32.mrb[93].mxu0  ;;  %v1760_v11 = vpack.c.bf16 %v1750_v32, %v1750_v32  ;;  %v4246_v32 = vld [vmem:[%s5224_s1 + $0x300] sm:$0xff]  }
 0x859   :  { %v1753_v0 = vpop.f32.mrb[94].mxu0  ;;  %v4247_v63 = vld [vmem:[%s5224_s1 + $0x308] sm:$0xff]  }
 0x85a   :  { %v3882_v3 = vpop.f32.mrb[95].mxu0  ;;  %v4248_v0 = vld [vmem:[%s5224_s1 + $0x310] sm:$0xff]  }
 0x85b   :  { %v4250_v3 = vld [vmem:[%s5224_s1 + $0x320] sm:$0xff]  }
 0x85e   :  { %3872 = vmatmul.mubr.msk.bf16.vlgmr.msra.gmra.mrb[88].mxu1 %vm1613_vm11, %v1551_v2  ;;  %v4249_v2 = vld [vmem:[%s5224_s1 + $0x318] sm:$0xff]  }
 0x85f   :  { %3884 = vmatpush3.bf16.msra.mxu1 %v4209_v37  ;;  %3887 = vmatprep.mubr.msk.bf16.mxu1 %vm4316_vm0, %v4315_v1  ;;  %v1855_v6 = vpop.f32.mrb[96].mxu0  ;;  %v3262_v37 = vld [vmem:[%s5225_s2 + $0x3] ss:$0 sm:$0xff] }
 0x860   :  { %3885 = vmatprep.subr.bf16.mxu1 %v4315_v1  ;;  %v3897_v8 = vpop.f32.mrb[97].mxu0  ;;  %v1865_v13 = vpack.c.bf16 %v1855_v6, %v1855_v6 }
 0x861   :  { %v1858_v42 = vpop.f32.mrb[98].mxu0 }
 0x862   :  { %v3898_v9 = vpop.f32.mrb[99].mxu0 }
 0x863   :  { %3886 = vmatpush3.bf16.msra.mxu1 %v4210_v5 }
 0x864   :  { %3899 = vmatprep.subr.bf16.mxu1 %v4315_v1 }
 0x86a   :  { %3888 = vmatmul.mubr.msk.bf16.vlgmr.msra.gmra.mrb[88].mxu1 %vm1613_vm11, %v1760_v11 }
 0x86b   :  { %3900 = vmatpush3.bf16.msra.mxu1 %v4211_v12  ;;  %3903 = vmatprep.mubr.msk.bf16.mxu1 %vm4316_vm0, %v4315_v1 }
 0x86c   :  { %3901 = vmatprep.subr.bf16.mxu1 %v4315_v1 }
 0x86f   :  { %3902 = vmatpush3.bf16.msra.mxu1 %v4212_v7  ;;  %v4251_v7 = vld [vmem:[%s5224_s1 + $0x328] sm:$0xff]  }
 0x870   :  { %3927 = vmatprep.subr.bf16.mxu1 %v4315_v1 }
 0x876   :  { %3904 = vmatmul.mubr.msk.bf16.vlgmr.msra.gmra.mrb[88].mxu1 %vm1613_vm11, %v1865_v13  ;;  %v4252_v13 = vld [vmem:[%s5224_s1 + $0x330] sm:$0xff]  }
 0x877   :  { %3943 = vmatprep.mubr.msk.bf16.mxu1 %vm4316_vm0, %v4315_v1  ;;  %3928 = vmatpush3.bf16.msra.mxu1 %v4221_v47  ;;  %v4254_v47 = vld [vmem:[%s5224_s1 + $0x340] sm:$0xff]  }
 0x878   :  { %3929 = vmatprep.subr.bf16.mxu1 %v4315_v1 }
 0x87b   :  { %3930 = vmatpush3.bf16.msra.mxu1 %v4222_v15  ;;  %v4255_v15 = vld [vmem:[%s5224_s1 + $0x348] sm:$0xff]  }
 0x87c   :  { %3931 = vmatprep.subr.bf16.mxu1 %v4315_v1 }
 0x87f   :  { %3932 = vmatpush3.bf16.msra.mxu1 %v4223_v16  ;;  %v3271_v16 = vld [vmem:[%s5225_s2 + $0x4] ss:$0 sm:$0xff] }
 0x880   :  { %3933 = vmatprep.subr.bf16.mxu1 %v4315_v1 }
 0x883   :  { %3934 = vmatpush3.bf16.msra.mxu1 %v4224_v17 }
 0x884   :  { %3935 = vmatprep.subr.bf16.mxu1 %v4315_v1 }
 0x887   :  { %3936 = vmatpush3.bf16.msra.mxu1 %v4225_v52 }
 0x888   :  { %3937 = vmatprep.subr.bf16.mxu1 %v4315_v1 }
 0x88b   :  { %3938 = vmatpush3.bf16.msra.mxu1 %v4226_v18 }
 0x88c   :  { %3939 = vmatprep.subr.bf16.mxu1 %v4315_v1 }
 0x88f   :  { %3940 = vmatpush3.bf16.msra.mxu1 %v4227_v57  ;;  %v4256_v57 = vld [vmem:[%s5224_s1 + $0x350] sm:$0xff]  }
 0x890   :  { %3941 = vmatprep.subr.bf16.mxu1 %v4315_v1 }
 0x893   :  { %3942 = vmatpush3.bf16.msra.mxu1 %v4228_v24  ;;  %v4265_v24 = vld [vmem:[%s5224_s1 + $0x398] sm:$0xff]  }
 0x894   :  { %3967 = vmatprep.subr.bf16.mxu1 %v4315_v1 }
 0x949   :  { %v4907_v19 = vpop.f32.mrb[88].mxu1 }
 0x94a   :  { %v1938_v20 = vpack.c.bf16 %v4907_v19, %v4907_v19  ;;  %v3905_v21 = vpop.f32.mrb[89].mxu1 }
 0x94b   :  { %v1918_v22 = vpop.f32.mrb[90].mxu1 }
 0x94c   :  { %v3906_v23 = vpop.f32.mrb[91].mxu1  ;;  %3924 = vmatmul.mubr.bf16.vlgmr.msra.gmra.mrb[100].mxu0 %v1938_v20 }
 0x94d   :  { %3963 = vmatprep.mubr.msk.bf16.mxu0 %vm4316_vm0, %v4315_v1  ;;  %3948 = vmatpush3.bf16.msra.mxu0 %v4229_v25  ;;  %v4266_v25 = vld [vmem:[%s5224_s1 + $0x3a0] sm:$0xff]  }
 0x94e   :  { %3949 = vmatprep.subr.bf16.mxu0 %v4315_v1 }
 0x951   :  { %3950 = vmatpush3.bf16.msra.mxu0 %v4230_v26  ;;  %v3280_v26 = vld [vmem:[%s5225_s2 + $0x5] ss:$0 sm:$0xff] }
 0x952   :  { %3951 = vmatprep.subr.bf16.mxu0 %v4315_v1 }
 0x955   :  { %3952 = vmatpush3.bf16.msra.mxu0 %v4231_v62 }
 0x956   :  { %3953 = vmatprep.subr.bf16.mxu0 %v4315_v1 }
 0x959   :  { %3954 = vmatpush3.bf16.msra.mxu0 %v4232_v28 }
 0x95a   :  { %3955 = vmatprep.subr.bf16.mxu0 %v4315_v1 }
 0x95d   :  { %3956 = vmatpush3.bf16.msra.mxu0 %v4233_v29 }
 0x95e   :  { %3957 = vmatprep.subr.bf16.mxu0 %v4315_v1 }
 0x961   :  { %3958 = vmatpush3.bf16.msra.mxu0 %v4234_v30 }
 0x962   :  { %3959 = vmatprep.subr.bf16.mxu0 %v4315_v1 }
 0x965   :  { %3960 = vmatpush3.bf16.msra.mxu0 %v4235_v39  ;;  %v4262_v39 = vld [vmem:[%s5224_s1 + $0x380] sm:$0xff]  }
 0x966   :  { %3961 = vmatprep.subr.bf16.mxu0 %v4315_v1 }
 0x969   :  { %3962 = vmatpush3.bf16.msra.mxu0 %v4236_v40  ;;  %v4263_v40 = vld [vmem:[%s5224_s1 + $0x388] sm:$0xff]  }
 0x96a   :  { %3987 = vmatprep.subr.bf16.mxu0 %v4315_v1 }
 0xa1f   :  { %v2026_v33 = vpop.f32.mrb[100].mxu0 }
 0xa20   :  { %v2027_v4 = vadd.f32 %v3244_v31, %v2026_v33  ;;  %v3925_v10 = vpop.f32.mrb[101].mxu0 }
 0xa21   :  { %v2029_v34 = vpop.f32.mrb[102].mxu0 }
 0xa22   :  { %v2032_v35 = vmax.f32 %v2027_v4, 0.0  ;;  %v3926_v36 = vpop.f32.mrb[103].mxu0  ;;  %v4257_v4 = vld [vmem:[%s5224_s1 + $0x358] sm:$0xff]   ;;  %v4258_v34 = vld [vmem:[%s5224_s1 + $0x360] sm:$0xff]  }
 0xa23   :  { %v4260_v36 = vld [vmem:[%s5224_s1 + $0x370] sm:$0xff]  }
 0xa24   :  { %v2049_v38 = vpack.c.bf16 %v2032_v35, %v2032_v35  ;;  %v4259_v35 = vld [vmem:[%s5224_s1 + $0x368] sm:$0xff]  }
 0xa26   :  { %3944 = vmatmul.mubr.bf16.vlgmr.msra.gmra.mrb[92].mxu1 %v2049_v38  ;;  %v4261_v38 = vld [vmem:[%s5224_s1 + $0x378] sm:$0xff]  }
 0xa27   :  { %3983 = vmatprep.mubr.msk.bf16.mxu1 %vm4316_vm0, %v4315_v1  ;;  %3968 = vmatpush3.bf16.msra.mxu1 %v4237_v41  ;;  %v4264_v41 = vld [vmem:[%s5224_s1 + $0x390] sm:$0xff]  }
 0xa28   :  { %3969 = vmatprep.subr.bf16.mxu1 %v4315_v1 }
 0xa2b   :  { %3970 = vmatpush3.bf16.msra.mxu1 %v4238_v43  ;;  %v4267_v43 = vld [vmem:[%s5224_s1 + $0x3a8] sm:$0xff]  }
 0xa2c   :  { %3971 = vmatprep.subr.bf16.mxu1 %v4315_v1 }
 0xa2f   :  { %3972 = vmatpush3.bf16.msra.mxu1 %v4239_v44  ;;  %v4268_v44 = vld [vmem:[%s5224_s1 + $0x3b0] sm:$0xff]  }
 0xa30   :  { %3973 = vmatprep.subr.bf16.mxu1 %v4315_v1 }
 0xa33   :  { %3974 = vmatpush3.bf16.msra.mxu1 %v4240_v45  ;;  %v3289_v45 = vld [vmem:[%s5225_s2 + $0x6] ss:$0 sm:$0xff] }
 0xa34   :  { %3975 = vmatprep.subr.bf16.mxu1 %v4315_v1 }
 0xa37   :  { %3976 = vmatpush3.bf16.msra.mxu1 %v4241_v46  ;;  %v3295_v46 = vld [vmem:[%s5225_s2 + $0x7] ss:$0 sm:$0xff] }
 0xa38   :  { %3977 = vmatprep.subr.bf16.mxu1 %v4315_v1 }
 0xa3b   :  { %3978 = vmatpush3.bf16.msra.mxu1 %v4242_v48  ;;  %v4099_v48 = vadd.f32 %v3295_v46, %v3289_v45 }
 0xa3c   :  { %3979 = vmatprep.subr.bf16.mxu1 %v4315_v1 }
 0xa3f   :  { %3980 = vmatpush3.bf16.msra.mxu1 %v4243_v60  ;;  %v4271_v60 = vld [vmem:[%s5224_s1 + $0x3c8] sm:$0xff]  }
 0xa40   :  { %3981 = vmatprep.subr.bf16.mxu1 %v4315_v1 }
 0xa43   :  { %3982 = vmatpush3.bf16.msra.mxu1 %v4244_v27  ;;  %v4272_v27 = vld [vmem:[%s5224_s1 + $0x3d0] sm:$0xff]  }
 0xa44   :  { %4007 = vmatprep.subr.bf16.mxu1 %v4315_v1 }
 0xaf9   :  { %v2137_v50 = vpop.f32.mrb[92].mxu1 }
 0xafa   :  { %v2138_v51 = vadd.f32 %v3253_v49, %v2137_v50  ;;  %v3945_v53 = vpop.f32.mrb[93].mxu1 }
 0xafb   :  { %v2140_v54 = vpop.f32.mrb[94].mxu1 }
 0xafc   :  { %v2143_v55 = vadd.f32 %v2138_v51, %v4907_v19  ;;  %v3946_v56 = vpop.f32.mrb[95].mxu1 }
 0xafd   :  { %v4269_v56 = vld [vmem:[%s5224_s1 + $0x3b8] sm:$0xff]  }
 0xafe   :  { %v2144_v58 = vmax.f32 %v2143_v55, 0.0 }
 0xb00   :  { %v2161_v59 = vpack.c.bf16 %v2144_v58, %v2144_v58 }
 0xb02   :  { %3964 = vmatmul.mubr.bf16.vlgmr.msra.gmra.mrb[104].mxu0 %v2161_v59  ;;  %v4270_v59 = vld [vmem:[%s5224_s1 + $0x3c0] sm:$0xff]  }
 0xb03   :  { %4003 = vmatprep.mubr.msk.bf16.mxu0 %vm4316_vm0, %v4315_v1  ;;  %3988 = vmatpush3.bf16.msra.mxu0 %v4245_v61  ;;  %v4273_v61 = vld [vmem:[%s5224_s1 + $0x3d8] sm:$0xff]  }
 0xb04   :  { %3989 = vmatprep.subr.bf16.mxu0 %v4315_v1 }
 0xb07   :  { %3990 = vmatpush3.bf16.msra.mxu0 %v4246_v32  ;;  %v4274_v32 = vld [vmem:[%s5224_s1 + $0x3e0] sm:$0xff]  }
 0xb08   :  { %3991 = vmatprep.subr.bf16.mxu0 %v4315_v1 }
 0xb0b   :  { %3992 = vmatpush3.bf16.msra.mxu0 %v4247_v63  ;;  %v3304_v63 = vld [vmem:[%s5225_s2 + $0x8] ss:$0 sm:$0xff] }
 0xb0c   :  { %3993 = vmatprep.subr.bf16.mxu0 %v4315_v1 }
 0xb0f   :  { %3994 = vmatpush3.bf16.msra.mxu0 %v4248_v0 }
 0xb10   :  { %3995 = vmatprep.subr.bf16.mxu0 %v4315_v1 }
 0xb13   :  { %3996 = vmatpush3.bf16.msra.mxu0 %v4249_v2 }
 0xb14   :  { %3997 = vmatprep.subr.bf16.mxu0 %v4315_v1 }
 0xb17   :  { %3998 = vmatpush3.bf16.msra.mxu0 %v4250_v3 }
 0xb18   :  { %3999 = vmatprep.subr.bf16.mxu0 %v4315_v1 }
 0xb1b   :  { %4000 = vmatpush3.bf16.msra.mxu0 %v4251_v7 }
 0xb1c   :  { %4001 = vmatprep.subr.bf16.mxu0 %v4315_v1 }
 0xb1f   :  { %4002 = vmatpush3.bf16.msra.mxu0 %v4252_v13 }
 0xb20   :  { %4039 = vmatprep.subr.bf16.mxu0 %v4315_v1 }
 0xbd5   :  { %v2249_v5 = vpop.f32.mrb[104].mxu0 }
 0xbd6   :  { %v2250_v6 = vadd.f32 %v3262_v37, %v2249_v5  ;;  %v3965_v8 = vpop.f32.mrb[105].mxu0 }
 0xbd7   :  { %v2252_v42 = vpop.f32.mrb[106].mxu0 }
 0xbd8   :  { %v2255_v9 = vmax.f32 %v2250_v6, 0.0  ;;  %v3966_v11 = vpop.f32.mrb[107].mxu0  ;;  %v4275_v42 = vld [vmem:[%s5224_s1 + $0x3e8] sm:$0xff]  }
 0xbd9   :  { %v3310_v11 = vld [vmem:[%s5225_s2 + $0x9] ss:$0 sm:$0xff] }
 0xbda   :  { %v2272_v12 = vpack.c.bf16 %v2255_v9, %v2255_v9  ;;  %v4276_v9 = vld [vmem:[%s5224_s1 + $0x3f0] sm:$0xff]  }
 0xbdc   :  { %3984 = vmatmul.mubr.bf16.vlgmr.msra.gmra.mrb[96].mxu1 %v2272_v12 }
 0xbdd   :  { %4015 = vmatprep.mubr.msk.bf16.mxu1 %vm4316_vm0, %v4315_v1  ;;  %4008 = vmatpush3.bf16.msra.mxu1 %v4253_v14 }
 0xbde   :  { %4009 = vmatprep.subr.bf16.mxu1 %v4315_v1 }
 0xbe1   :  { %4010 = vmatpush3.bf16.msra.mxu1 %v4254_v47 }
 0xbe2   :  { %4011 = vmatprep.subr.bf16.mxu1 %v4315_v1 }
 0xbe5   :  { %4012 = vmatpush3.bf16.msra.mxu1 %v4255_v15 }
 0xbe6   :  { %4013 = vmatprep.subr.bf16.mxu1 %v4315_v1 }
 0xbe9   :  { %4014 = vmatpush3.bf16.msra.mxu1 %v4256_v57 }
 0xbea   :  { %4019 = vmatprep.subr.bf16.mxu1 %v4315_v1 }
 0xcaf   :  { %v2360_v17 = vpop.f32.mrb[96].mxu1 }
 0xcb0   :  { %v2361_v52 = vadd.f32 %v3271_v16, %v2360_v17  ;;  %v3985_v18 = vpop.f32.mrb[97].mxu1 }
 0xcb1   :  { %v2363_v19 = vpop.f32.mrb[98].mxu1  ;;  %v4278_v18 = vld [vmem:[%s5224_s1 + $0x400] sm:$0xff]  }
 0xcb2   :  { %v2366_v20 = vadd.f32 %v2361_v52, %v2144_v58  ;;  %v3986_v21 = vpop.f32.mrb[99].mxu1  ;;  %v4277_v52 = vld [vmem:[%s5224_s1 + $0x3f8] sm:$0xff]   ;;  %v4279_v19 = vld [vmem:[%s5224_s1 + $0x408] sm:$0xff]  }
 0xcb3   :  { %v3316_v21 = vld [vmem:[%s5225_s2 + $0xa] ss:$0 sm:$0xff] }
 0xcb4   :  { %v2367_v22 = vmax.f32 %v2366_v20, 0.0  ;;  %v4280_v20 = vld [vmem:[%s5224_s1 + $0x410] sm:$0xff]  }
 0xcb6   :  { %v2384_v23 = vpack.c.bf16 %v2367_v22, %v2367_v22 }
 0xcb8   :  { %4004 = vmatmul.mubr.bf16.vlgmr.msra.gmra.mrb[108].mxu0 %v2384_v23 }
 0xcb9   :  { %4047 = vmatprep.mubr.msk.bf16.mxu0 %vm4316_vm0, %v4315_v1  ;;  %4040 = vmatpush3.bf16.msra.mxu0 %v4265_v24 }
 0xcba   :  { %4041 = vmatprep.subr.bf16.mxu0 %v4315_v1 }
 0xcbd   :  { %4042 = vmatpush3.bf16.msra.mxu0 %v4266_v25 }
 0xcbe   :  { %4043 = vmatprep.subr.bf16.mxu0 %v4315_v1 }
 0xcc1   :  { %4044 = vmatpush3.bf16.msra.mxu0 %v4267_v43 }
 0xcc2   :  { %4045 = vmatprep.subr.bf16.mxu0 %v4315_v1 }
 0xcc5   :  { %4046 = vmatpush3.bf16.msra.mxu0 %v4268_v44 }
 0xcc6   :  { %4051 = vmatprep.subr.bf16.mxu0 %v4315_v1 }
 0xd8b   :  { %v2472_v62 = vpop.f32.mrb[108].mxu0 }
 0xd8c   :  { %v2473_v28 = vadd.f32 %v3280_v26, %v2472_v62  ;;  %v4005_v29 = vpop.f32.mrb[109].mxu0 }
 0xd8d   :  { %v2475_v30 = vpop.f32.mrb[110].mxu0  ;;  %v3322_v29 = vld [vmem:[%s5225_s2 + $0xb] ss:$0 sm:$0xff] }
 0xd8e   :  { %v2478_v31 = vmax.f32 %v2473_v28, 0.0  ;;  %v4006_v33 = vpop.f32.mrb[111].mxu0  ;;  %v4319_v28 = vmov 0  }
 0xd8f   :  { %4146 = vset.pattern.permute.xlu1 %v4319_v28  ;;  %4147 = vset.pattern.permute.xlu0 %v4319_v28 }
 0xd90   :  { %v2487_v10 = vpack.c.bf16 %v2478_v31, %v2478_v31 }
 0xd92   :  { %4016 = vmatmul.mubr.msk.bf16.vlgmr.msra.gmra.mrb[100].mxu1 %vm1414_vm8, %v2487_v10 }
 0xd93   :  { %4020 = vmatpush3.bf16.msra.mxu1 %v4257_v4  ;;  %4035 = vmatprep.mubr.msk.bf16.mxu1 %vm4316_vm0, %v4315_v1 }
 0xd94   :  { %4021 = vmatprep.subr.bf16.mxu1 %v4315_v1 }
 0xd97   :  { %4022 = vmatpush3.bf16.msra.mxu1 %v4258_v34 }
 0xd98   :  { %4023 = vmatprep.subr.bf16.mxu1 %v4315_v1 }
 0xd9b   :  { %4024 = vmatpush3.bf16.msra.mxu1 %v4259_v35 }
 0xd9c   :  { %4025 = vmatprep.subr.bf16.mxu1 %v4315_v1 }
 0xd9f   :  { %4026 = vmatpush3.bf16.msra.mxu1 %v4260_v36 }
 0xda0   :  { %4027 = vmatprep.subr.bf16.mxu1 %v4315_v1 }
 0xda3   :  { %4028 = vmatpush3.bf16.msra.mxu1 %v4261_v38 }
 0xda4   :  { %4029 = vmatprep.subr.bf16.mxu1 %v4315_v1 }
 0xda7   :  { %4030 = vmatpush3.bf16.msra.mxu1 %v4262_v39 }
 0xda8   :  { %4031 = vmatprep.subr.bf16.mxu1 %v4315_v1 }
 0xdab   :  { %4032 = vmatpush3.bf16.msra.mxu1 %v4263_v40 }
 0xdac   :  { %4033 = vmatprep.subr.bf16.mxu1 %v4315_v1 }
 0xdaf   :  { %4034 = vmatpush3.bf16.msra.mxu1 %v4264_v41 }
 0xdb0   :  { %4063 = vmatprep.subr.bf16.mxu1 %v4315_v1 }
 0xdb2   :  { %4036 = vmatmul.mubr.bf16.vlgmr.msra.gmra.mrb[100].mxu1 %v2384_v23 }
 0xdb3   :  { %4071 = vmatprep.mubr.msk.bf16.mxu1 %vm4316_vm0, %v4315_v1  ;;  %4064 = vmatpush3.bf16.msra.mxu1 %v4273_v61 }
 0xdb4   :  { %4065 = vmatprep.subr.bf16.mxu1 %v4315_v1 }
 0xdb7   :  { %4066 = vmatpush3.bf16.msra.mxu1 %v4274_v32 }
 0xdb8   :  { %4067 = vmatprep.subr.bf16.mxu1 %v4315_v1 }
 0xdbb   :  { %4068 = vmatpush3.bf16.msra.mxu1 %v4275_v42 }
 0xdbc   :  { %4069 = vmatprep.subr.bf16.mxu1 %v4315_v1 }
 0xdbf   :  { %4070 = vmatpush3.bf16.msra.mxu1 %v4276_v9 }
 0xdc0   :  { %4087 = vmatprep.subr.bf16.mxu1 %v4315_v1 }
 0xe85   :  { %v2663_v49 = vpop.f32.mrb[100].mxu1 }
 0xe86   :  { %v4100_v50 = vadd.f32 %v4099_v48, %v2663_v49  ;;  %v4037_v51 = vpop.f32.mrb[101].mxu1 }
 0xe87   :  { %v2666_v53 = vpop.f32.mrb[102].mxu1 }
 0xe88   :  { %v2670_v54 = vmax.f32 %v4100_v50, 0.0  ;;  %v4038_v55 = vpop.f32.mrb[103].mxu1 }
 0xe8a   :  { %v2679_v58 = vpack.c.bf16 %v2670_v54, %v2670_v54 }
 0xe8c   :  { %4048 = vmatmul.mubr.msk.bf16.vlgmr.msra.gmra.mrb[112].mxu0 %vm1414_vm8, %v2679_v58  ;;  %v4281_v58 = vld [vmem:[%s5224_s1 + $0x418] sm:$0xff]  }
 0xe8d   :  { %4052 = vmatpush3.bf16.msra.mxu0 %v4269_v56  ;;  %4059 = vmatprep.mubr.msk.bf16.mxu0 %vm4316_vm0, %v4315_v1 }
 0xe8e   :  { %4053 = vmatprep.subr.bf16.mxu0 %v4315_v1 }
 0xe91   :  { %4054 = vmatpush3.bf16.msra.mxu0 %v4270_v59  ;;  %v4282_v59 = vld [vmem:[%s5224_s1 + $0x420] sm:$0xff]  }
 0xe92   :  { %4055 = vmatprep.subr.bf16.mxu0 %v4315_v1 }
 0xe95   :  { %4056 = vmatpush3.bf16.msra.mxu0 %v4271_v60  ;;  %v4283_v60 = vld [vmem:[%s5224_s1 + $0x428] sm:$0xff]  }
 0xe96   :  { %4057 = vmatprep.subr.bf16.mxu0 %v4315_v1 }
 0xe99   :  { %4058 = vmatpush3.bf16.msra.mxu0 %v4272_v27  ;;  %v4284_v27 = vld [vmem:[%s5224_s1 + $0x430] sm:$0xff]   ;;  %s4320_s1 = smov [#allocation2]  }
 0xe9a   :  { %4075 = vmatprep.subr.bf16.mxu0 %v4315_v1  ;;  %s3118_s14 = sshll.u32 %s4320_s1, 4  ;;  %s3119_s14 = int_to_ptr.vmem [resolvable:$true] %s3118_s14 }
 0xe9b   :  { %s4291_s15 = scalar_lea.vmem %s3119_s14, 16  ;;  %s4295_s16 = scalar_lea.vmem %s3119_s14, 32 }
 0xe9c   :  { %p4292_p0 = scmp.ne.s32.totalorder %s3119_s14, %s4291_s15  ;;  %p4296_p1 = scmp.lt.s32.totalorder %s3119_s14, %s3119_s14 }
 0xe9d   :  { %p4297_p2 = scmp.lt.s32.totalorder %s4295_s16, %s4291_s15 }
 0xe9f   :  { %p4298_p3 = por %p4297_p2, %p4296_p1 }
 0xea1   :  { %p4299_p4 = pnand %p4298_p3, %p4292_p0 }
 0xf5f   :  { %v2746_v0 = vpop.f32.mrb[112].mxu0 }
 0xf60   :  { %v2747_v2 = vadd.f32 %v3304_v63, %v2746_v0  ;;  %v4049_v3 = vpop.f32.mrb[113].mxu0 }
 0xf61   :  { %v2749_v37 = vpop.f32.mrb[114].mxu0 }
 0xf62   :  { %v2752_v5 = vmax.f32 %v2747_v2, 0.0  ;;  %v4050_v6 = vpop.f32.mrb[115].mxu0 }
 0xf64   :  { %v2761_v8 = vpack.c.bf16 %v2752_v5, %v2752_v5 }
 0xf66   :  { %4060 = vmatmul.mubr.msk.bf16.vlgmr.msra.gmra.mrb[116].mxu0 %vm1414_vm8, %v2761_v8 }
 0xf67   :  { %4083 = vmatprep.mubr.msk.bf16.mxu0 %vm4316_vm0, %v4315_v1  ;;  %4076 = vmatpush3.bf16.msra.mxu0 %v4277_v52 }
 0xf68   :  { %4077 = vmatprep.subr.bf16.mxu0 %v4315_v1 }
 0xf6b   :  { %4078 = vmatpush3.bf16.msra.mxu0 %v4278_v18 }
 0xf6c   :  { %4079 = vmatprep.subr.bf16.mxu0 %v4315_v1 }
 0xf6f   :  { %4080 = vmatpush3.bf16.msra.mxu0 %v4279_v19 }
 0xf70   :  { %4081 = vmatprep.subr.bf16.mxu0 %v4315_v1 }
 0xf73   :  { %4082 = vmatpush3.bf16.msra.mxu0 %v4280_v20 }
0x1039   :  { %v2828_v12 = vpop.f32.mrb[116].mxu0 }
0x103a   :  { %v2829_v7 = vadd.f32 %v3310_v11, %v2828_v12  ;;  %v4061_v13 = vpop.f32.mrb[117].mxu0 }
0x103b   :  { %v2831_v14 = vpop.f32.mrb[118].mxu0 }
0x103c   :  { %v2834_v47 = vadd.f32 %v2829_v7, %v2670_v54  ;;  %v4062_v15 = vpop.f32.mrb[119].mxu0 }
0x103e   :  { %v5160_v16 = vmax.f32 %v2834_v47, 0.0 }
0x1040   :  { %v2844_v17 = vpack.c.bf16 %v5160_v16, %v5160_v16 }
0x1042   :  { %4072 = vmatmul.mubr.msk.bf16.vlgmr.msra.gmra.mrb[104].mxu1 %vm1414_vm8, %v2844_v17 }
0x1043   :  { %4095 = vmatprep.mubr.msk.bf16.mxu1 %vm4316_vm0, %v4315_v1  ;;  %4088 = vmatpush3.bf16.msra.mxu1 %v4281_v58 }
0x1044   :  { %4089 = vmatprep.subr.bf16.mxu1 %v4315_v1 }
0x1047   :  { %4090 = vmatpush3.bf16.msra.mxu1 %v4282_v59 }
0x1048   :  { %4091 = vmatprep.subr.bf16.mxu1 %v4315_v1 }
0x104b   :  { %4092 = vmatpush3.bf16.msra.mxu1 %v4283_v60 }
0x104c   :  { %4093 = vmatprep.subr.bf16.mxu1 %v4315_v1  ;;  %v3042_v1 = vld [vmem:[%s5225_s2 + $0xc] sm:$0x1] }
0x104f   :  { %4094 = vmatpush3.bf16.msra.mxu1 %v4284_v27 }
0x1115   :  { %v2911_v22 = vpop.f32.mrb[104].mxu1 }
0x1116   :  { %v2912_v23 = vadd.f32 %v3316_v21, %v2911_v22  ;;  %v4073_v57 = vpop.f32.mrb[105].mxu1 }
0x1117   :  { %v2914_v24 = vpop.f32.mrb[106].mxu1 }
0x1118   :  { %4285 = vtanh.f32 %v2912_v23  ;;  %v4074_v25 = vpop.f32.mrb[107].mxu1 }
0x1122   :  { %v4286_v26 = vpop.eup %4285 }
0x1123   :  { %v2926_v62 = vpack.c.bf16 %v4286_v26, %v4286_v26 }
0x1125   :  { %4084 = vmatmul.mubr.msk.bf16.vlgmr.msra.gmra.mrb[120].mxu0 %vm1414_vm8, %v2926_v62 }
0x11f8   :  { %v2993_v30 = vpop.f32.mrb[120].mxu0 }
0x11f9   :  { %v2994_v31 = vadd.f32 %v3322_v29, %v2993_v30  ;;  %v4085_v33 = vpop.f32.mrb[121].mxu0 }
0x11fa   :  { %v2996_v4 = vpop.f32.mrb[122].mxu0 }
0x11fb   :  { %v3000_v10 = vsel %vm2999_vm12, %v2994_v31, -inf  ;;  %v4086_v34 = vpop.f32.mrb[123].mxu0 }
0x11fc   :  { %v3001_v35 = vrot.slane %v3000_v10, 4 }
0x11fe   :  { %v3002_v36 = vmax.f32 %v3000_v10, %v3001_v35 }
0x1200   :  { %v3003_v38 = vrot.slane %v3002_v36, 2 }
0x1202   :  { %v3004_v39 = vmax.f32 %v3002_v36, %v3003_v38 }
0x1204   :  { %v3005_v40 = vrot.slane %v3004_v39, 1 }
0x1206   :  { %v3006_v41 = vmax.f32 %v3004_v39, %v3005_v40 }
0x1208   :  { %v3007_v43 = vsub.f32 %v2994_v31, %v3006_v41 }
0x120a   :  { %v3008_v44 = vmul.f32 1.442695, %v3007_v43 }
0x120c   :  { %4287 = vpow2.f32 %v3008_v44 }
0x1216   :  { %v4288_v45 = vpop.eup %4287 }
0x1217   :  { %v3010_v46 = vsel %vm2999_vm12, %v4288_v45, 0.0 }
0x1218   :  { %v3011_v48 = vrot.slane %v3010_v46, 4 }
0x121a   :  { %v3012_v49 = vadd.f32 %v3011_v48, %v3010_v46 }
0x121c   :  { %v3013_v50 = vrot.slane %v3012_v49, 2 }
0x121e   :  { %v3014_v51 = vadd.f32 %v3013_v50, %v3012_v49 }
0x1220   :  { %v3015_v53 = vrot.slane %v3014_v51, 1 }
0x1222   :  { %v3016_v54 = vadd.f32 %v3015_v53, %v3014_v51 }
0x1224   :  { %4289 = vrcp.f32 %v3016_v54 }
0x122e   :  { %v4290_v55 = vpop.eup %4289 }
0x122f   :  { %v3018_v56 = vmul.f32 %v4290_v55, %v4288_v45 }
0x1231   :  { %3021 = vperm.xlu1 %4146, %v3018_v56  }
0x12b0   :  { %v3022_v61 = vpop.permute.xlu1 %3021 }
0x12b1   :  { %v3024_v32 = vmul.f32 %v3022_v61, %v5160_v16 }
0x12b3   :  { %v3026_v63 = vsel %vm3025_vm13, %v3024_v32, 0.0 }
0x12b4   :  { %v3027_v0 = vrot.slane %v3026_v63, 4 }
0x12b6   :  { %v3028_v2 = vadd.f32 %v3027_v0, %v3026_v63 }
0x12b8   :  { %v3029_v3 = vrot.slane %v3028_v2, 2 }
0x12ba   :  { %v3030_v37 = vadd.f32 %v3029_v3, %v3028_v2 }
0x12bc   :  { %v3031_v5 = vrot.slane %v3030_v37, 1 }
0x12be   :  { %v3032_v6 = vadd.f32 %v3031_v5, %v3030_v37 }
0x12c0   :  { %v3041_v8 = vpack.c.bf16 %v3032_v6, %v3032_v6 }
0x12c2   :  { %4096 = vmatmul.mubr.msk.bf16.vlgmr.msra.gmra.mrb[108].mxu1 %vm1414_vm8, %v3041_v8 }
0x1395   :  { %v3104_v42 = vpop.f32.mrb[108].mxu1 }
0x1396   :  { %v3105_v9 = vadd.f32 %v3104_v42, %v3042_v1  ;;  %v4097_v11 = vpop.f32.mrb[109].mxu1 }
0x1397   :  { %v3107_v12 = vpop.f32.mrb[110].mxu1 }
0x1398   :  { %v4098_v7 = vpop.f32.mrb[111].mxu1  ;;  %3111 = vst.msk [vmem:[#allocation2] sm:$0x1] %vm3110_vm14, %v3105_v9 }
0x1399   :  { %4302 = shalt.err (!%p4299_p4)
}
0x139a   :  { %s4303_s18 = scalar_lea.hbm %s5226_s3, 16 }
0x139b   :  { %p4304_p5 = scmp.ne.s32.totalorder %s5226_s3, %s4303_s18  ;;  %p4307_p6 = scmp.lt.u32.totalorder %s4303_s18, %s5226_s3 }
0x139d   :  { %p4309_p7 = pnand %p4307_p6, %p4304_p5 }
0x139f   :  { %4312 = shalt.err (!%p4309_p7)
}
0x13a0   :  { %3121 = dma.vmem_to_hbm [thread:$0]  %s3119_s14, 16, %s5226_s3, [#allocation3]  }
0x13a1   :  { %4313 = dma.done.wait [#allocation3], 16  }
0x13a2   :  { %4314 = vsyncadd [#allocation3], 4294967280 }
0x13a3   :  { %3125 = vsyncpa [#allocation3], 1 }

</bundles_post_ra>
